<compile_context>
chip_gen: v7x
topology: tpu7x:2x2x1
jax: 0.10.0
libtpu: 0.0.40
codegen_flags: <defaults>
</compile_context>

<pallas_src>
import math

import numpy as np
import jax
import jax.numpy as jnp
from jax import lax
from jax.experimental import pallas as pl
from jax.experimental.pallas import tpu as pltpu

# Make the pure-JAX reference use full-f32 matmuls so the sanity check is meaningful.
jax.config.update("jax_default_matmul_precision", "highest")


def _eye(n, dtype=jnp.float32):
    r = lax.broadcasted_iota(jnp.int32, (n, n), 0)
    c = lax.broadcasted_iota(jnp.int32, (n, n), 1)
    return (r == c).astype(dtype)


# ---------------------------------------------------------------------------
# Fused kernel: one grid step per output dim d.  Everything stays in vregs/VMEM.
#   inputs (per step):
#     xz    : (NM, In)         concatenated [X; Z]
#     w1    : (In, S*H)        all S first-layer weights, sample-major columns
#     b1    : (1, S*H)
#     w2c   : (S*H, S)         block-diagonal second layer for this output dim
#     b2    : (1, S)
#     Lq    : (M, M)           dense lower-triangular q_sqrt[:, :, d]
#     qmu   : (1, M)           q_mu[:, d]
#   output (per step):
#     out   : (2, N)           row 0 = mean[:, d], row 1 = K[d, :]
# ---------------------------------------------------------------------------
def _fused_vip_kernel(xz_ref, w1_ref, b1_ref, w2_ref, b2_ref,
                      qsqrt_ref, qmu_ref, out_ref):
    NM = xz_ref.shape[0]
    M = qsqrt_ref.shape[-1]
    N = NM - M
    S = w2_ref.shape[-1]

    xz = xz_ref[...]            # (NM, In)
    w1 = w1_ref[...]            # (In, S*H)
    b1 = b1_ref[...]            # (1, S*H)
    w2c = w2_ref[0]             # (S*H, S)
    b2 = b2_ref[0]              # (1, S)
    Lq = qsqrt_ref[0]           # (M, M)
    qmu = qmu_ref[0]            # (1, M)

    # --- BNN prior samples: all S samples in one lane-dense matmul pair -------
    h = jnp.tanh(jnp.dot(xz, w1, preferred_element_type=jnp.float32) + b1)   # (NM, S*H)
    fd = jnp.dot(h, w2c, preferred_element_type=jnp.float32) + b2            # (NM, S)

    # --- centering + empirical covariance, contraction over the lane axis ----
    phi = (fd - jnp.mean(fd, axis=1, keepdims=True)) * (1.0 / math.sqrt(S - 1))
    Kmat = lax.dot_general(phi, phi, (((1,), (1,)), ((), ())),
                           preferred_element_type=jnp.float32)               # (NM, NM)

    eye_m = _eye(M)
    Kuf = Kmat[N:, :N]                              # (M, N) == Kfu^T
    Ku = Kmat[N:, N:] + 2e-6 * eye_m                # (M, M)
    Ku_reg = Ku + 1e-4 * eye_m                      # matrix actually inverted

    # --- unrolled Gauss-Jordan inverse of the small SPD Ku_reg ----------------
    # (equivalent to the Cholesky + two triangular solves of the reference:
    #  A = Kfu @ Ku_reg^{-1})
    aug = jnp.concatenate([Ku_reg, eye_m], axis=1)  # (M, 2M)
    row_ids = lax.broadcasted_iota(jnp.int32, (M, 1), 0)
    for k in range(M):                              # M small & static -> unrolled
        pivot = aug[k:k + 1, k:k + 1]               # (1, 1)
        rowk = aug[k:k + 1, :] / pivot              # (1, 2M)
        colk = jnp.where(row_ids == k, 0.0, aug[:, k:k + 1])
        aug = aug - colk * rowk
        aug = jnp.where(row_ids == k, rowk, aug)
    ku_inv = aug[:, M:]                             # (M, M)

    # --- posterior moments (A^T orientation keeps every matmul standard-form) -
    At = jnp.dot(ku_inv, Kuf, preferred_element_type=jnp.float32)     # (M, N) == A^T
    mean_row = jnp.dot(qmu, At, preferred_element_type=jnp.float32)   # (1, N)

    SK = lax.dot_general(Lq, Lq, (((1,), (1,)), ((), ())),
                         preferred_element_type=jnp.float32) - Ku     # (M, M)
    SKAt = jnp.dot(SK, At, preferred_element_type=jnp.float32)        # (M, N)
    delta_row = jnp.sum(At * SKAt, axis=0, keepdims=True)             # (1, N)

    # diag(Kf) directly from phi (O(N*S)); the tiny identity matmul only converts
    # the (N,1) column to a (1,N) row on the MXU (no N x N mask-reduce, no XLU
    # transpose).
    phi_x = phi[:N, :]
    kf_col = jnp.sum(phi_x * phi_x, axis=1, keepdims=True) + 2e-6     # (N, 1)
    kf_row = lax.dot_general(kf_col, _eye(N), (((0,), (0,)), ((), ())),
                             preferred_element_type=jnp.float32)      # (1, N)

    out_ref[0, 0:1, :] = mean_row
    out_ref[0, 1:2, :] = kf_row + delta_row


# ---------------------------------------------------------------------------
# Forward pass: cheap layout plumbing in JAX, all math in the fused kernel.
# ---------------------------------------------------------------------------
def vip_layer_inducing_forward(X, params):
    Z = params["inducing_points"]
    q_mu = params["q_mu"]              # (M, D)
    q_sqrt_tri = params["q_sqrt_tri"]  # (M*(M+1)/2, D)
    w1, b1, w2, b2 = params["w1"], params["b1"], params["w2"], params["b2"]

    N, In = X.shape
    M = Z.shape[0]
    D = q_mu.shape[1]
    S, _, H = w1.shape
    NM = N + M
    SH = S * H
    f32 = jnp.float32

    X_and_Z = jnp.concatenate([X, Z], axis=0).astype(f32)             # (NM, In)

    # Collapse the sample axis: one (In, S*H) first layer ...
    w1_all = jnp.transpose(w1, (1, 0, 2)).reshape(In, SH)             # (In, S*H)
    b1_all = b1.reshape(1, SH)                                        # (1, S*H)
    # ... and a per-output-dim block-diagonal second layer (columns ordered (d, s)).
    eye_s = jnp.eye(S, dtype=f32)
    w2col = jnp.einsum("st,shd->dsht", eye_s, w2).reshape(D, SH, S)   # (D, S*H, S)
    b2_ds = jnp.transpose(b2[:, 0, :], (1, 0)).reshape(D, 1, S)       # (D, 1, S)

    # Dense lower-triangular q_sqrt WITHOUT a scatter: constant packing matrix.
    li, lj = np.tril_indices(M)
    T = li.shape[0]
    pack = np.zeros((M * M, T), np.float32)
    pack[li * M + lj, np.arange(T)] = 1.0
    q_sqrt_dmm = (jnp.asarray(pack) @ q_sqrt_tri.astype(f32)).T.reshape(D, M, M)

    q_mu_t = jnp.transpose(q_mu.astype(f32), (1, 0)).reshape(D, 1, M)  # (D, 1, M)

    flops = D * (2 * NM * In * SH + 2 * NM * SH * S + 2 * NM * S * NM
                 + 8 * M * M * M + 4 * M * M * N + 2 * M * N
                 + 4 * M * N + 2 * N * S + 2 * N * N)
    bytes_accessed = 4 * (NM * In + In * SH + SH
                          + D * (SH * S + S + M * M + M) + D * 2 * N)

    out = pl.pallas_call(
        _fused_vip_kernel,
        out_shape=jax.ShapeDtypeStruct((D, 2, N), f32),
        grid=(D,),
        in_specs=[
            pl.BlockSpec((NM, In), lambda d: (0, 0)),
            pl.BlockSpec((In, SH), lambda d: (0, 0)),
            pl.BlockSpec((1, SH), lambda d: (0, 0)),
            pl.BlockSpec((1, SH, S), lambda d: (d, 0, 0)),
            pl.BlockSpec((1, 1, S), lambda d: (d, 0, 0)),
            pl.BlockSpec((1, M, M), lambda d: (d, 0, 0)),
            pl.BlockSpec((1, 1, M), lambda d: (d, 0, 0)),
        ],
        out_specs=pl.BlockSpec((1, 2, N), lambda d: (d, 0, 0)),
        compiler_params=pltpu.CompilerParams(
            dimension_semantics=("parallel",)),
        cost_estimate=pl.CostEstimate(
            flops=flops, transcendentals=D * NM * SH,
            bytes_accessed=bytes_accessed),
    )(X_and_Z, w1_all, b1_all, w2col, b2_ds, q_sqrt_dmm, q_mu_t)

    mean = jnp.transpose(out[:, 0, :], (1, 0))   # (N, D)
    K = out[:, 1, :]                             # (D, N)
    # TODO(synk): optional log_layer_noise / mean_function branches (None by default
    # in the module) and the KL() method are not implemented here.
    return mean, K


# ---------------------------------------------------------------------------
# Pure-JAX reference (mirrors the PyTorch forward exactly) for a sanity check
# ---------------------------------------------------------------------------
def reference_forward(X, params):
    Z = params["inducing_points"]
    q_mu = params["q_mu"]
    q_sqrt_tri = params["q_sqrt_tri"]
    w1, b1, w2, b2 = params["w1"], params["b1"], params["w2"], params["b2"]
    N, M, D = X.shape[0], Z.shape[0], q_mu.shape[1]

    X_and_Z = jnp.concatenate([X, Z], axis=0)
    h = jnp.tanh(jnp.einsum("ni,sih->snh", X_and_Z, w1) + b1)
    f = jnp.einsum("snh,shd->snd", h, w2) + b2
    f_mean = jnp.mean(f, axis=0, keepdims=True)
    phi = (f - f_mean) / jnp.sqrt(jnp.float32(f.shape[0] - 1))
    f_K = jnp.einsum("snd,smd->nmd", phi, phi)
    Ku = jnp.transpose(f_K[N:, N:], (2, 0, 1)) + 2e-6 * jnp.eye(M)
    Kf = jnp.transpose(f_K[:N, :N], (2, 0, 1)) + 2e-6 * jnp.eye(N)
    Kfu = jnp.transpose(f_K[:N, N:], (2, 0, 1))
    Lu = jnp.linalg.cholesky(Ku + 1e-4 * jnp.eye(M))
    A1 = lax.linalg.triangular_solve(Lu, Kfu, left_side=False, lower=True, transpose_a=True)
    A = lax.linalg.triangular_solve(Lu, A1, left_side=False, lower=True, transpose_a=False)
    mean = jnp.einsum("dnm,md->nd", A, q_mu)
    li, lj = jnp.tril_indices(M)
    q_sqrt = jnp.zeros((M, M, D), jnp.float32).at[li, lj].set(q_sqrt_tri)
    SK = jnp.einsum("nmd,bmd->dnb", q_sqrt, q_sqrt) - Ku
    B = jnp.einsum("dmb,dnb->dmn", SK, A)
    delta_cov = jnp.sum(A * jnp.transpose(B, (0, 2, 1)), -1)
    K = jnp.diagonal(Kf, axis1=1, axis2=2) + delta_cov
    return mean, K


# ---------------------------------------------------------------------------
# Deterministic parameter construction (mirrors VIPLayerInducing.__init__ with a
# small BNN generative function)
# ---------------------------------------------------------------------------
def init_params(key, *, input_dim, hidden, num_samples, num_inducing, output_dim,
                q_mu_initial_value=0.5, q_sqrt_initial_value=1.0):
    k1, k2, k3, k4, k5 = jax.random.split(key, 5)
    Z = jax.random.normal(k1, (num_inducing, input_dim), jnp.float32)
    w1 = jax.random.normal(k2, (num_samples, input_dim, hidden), jnp.float32) / math.sqrt(input_dim)
    b1 = 0.1 * jax.random.normal(k3, (num_samples, 1, hidden), jnp.float32)
    w2 = jax.random.normal(k4, (num_samples, hidden, output_dim), jnp.float32) / math.sqrt(hidden)
    b2 = 0.1 * jax.random.normal(k5, (num_samples, 1, output_dim), jnp.float32)
    q_mu = jnp.full((num_inducing, output_dim), q_mu_initial_value, jnp.float32)
    q_sqrt_full = jnp.tile(
        (jnp.eye(num_inducing, dtype=jnp.float32) * q_sqrt_initial_value)[:, :, None],
        (1, 1, output_dim),
    )
    li, lj = jnp.tril_indices(num_inducing)
    q_sqrt_tri = q_sqrt_full[li, lj]                      # (M*(M+1)/2, D)
    return dict(inducing_points=Z, q_mu=q_mu, q_sqrt_tri=q_sqrt_tri,
                w1=w1, b1=b1, w2=w2, b2=b2)


if __name__ == "__main__":
    # Small shapes: batch N=8, input_dim=4, inducing M=8, output_dim D=2,
    # prior samples S=16, BNN hidden H=16.
    N, In, M, D, S, H = 8, 4, 8, 2, 16, 16
    key = jax.random.PRNGKey(0)
    kx, kp = jax.random.split(key)
    X = jax.random.normal(kx, (N, In), jnp.float32)
    params = init_params(kp, input_dim=In, hidden=H, num_samples=S,
                         num_inducing=M, output_dim=D)

    mean, K = jax.jit(vip_layer_inducing_forward)(X, params)
    jax.block_until_ready((mean, K))
    assert mean.shape == (N, D) and K.shape == (D, N)

    mean_ref, K_ref = reference_forward(X, params)
    assert np.allclose(np.asarray(mean), np.asarray(mean_ref), rtol=1e-2, atol=1e-2)
    assert np.allclose(np.asarray(K), np.asarray(K_ref), rtol=1e-2, atol=1e-2)

    print("KERNEL_OK")
</pallas_src>

<mosaic_0001>
module attributes {stable_mosaic.version = 11 : i64} {
  func.func @_fused_vip_kernel(%arg0: i32, %arg1: memref<16x4xf32, #tpu.memory_space<vmem>>, %arg2: memref<4x256xf32, #tpu.memory_space<vmem>>, %arg3: memref<1x256xf32, #tpu.memory_space<vmem>>, %arg4: memref<1x256x16xf32, #tpu.memory_space<vmem>>, %arg5: memref<1x1x16xf32, #tpu.memory_space<vmem>>, %arg6: memref<1x8x8xf32, #tpu.memory_space<vmem>>, %arg7: memref<1x1x8xf32, #tpu.memory_space<vmem>>, %arg8: memref<1x2x8xf32, #tpu.memory_space<vmem>>) attributes {dimension_semantics = [#tpu.dimension_semantics<parallel>], iteration_bounds = array<i64: 2>, scalar_prefetch = 0 : i64, scratch_operands = 0 : i64, tpu.core_type = #tpu.core_type<tc>, window_params = [{pipeline_mode = #tpu.pipeline_mode<synchronous>, transform_indices = @transform_0, window_bounds = array<i64: 16, 4>}, {pipeline_mode = #tpu.pipeline_mode<synchronous>, transform_indices = @transform_1, window_bounds = array<i64: 4, 256>}, {pipeline_mode = #tpu.pipeline_mode<synchronous>, transform_indices = @transform_2, window_bounds = array<i64: 1, 256>}, {transform_indices = @transform_3, window_bounds = array<i64: 1, 256, 16>}, {transform_indices = @transform_4, window_bounds = array<i64: 1, 1, 16>}, {transform_indices = @transform_5, window_bounds = array<i64: 1, 8, 8>}, {transform_indices = @transform_6, window_bounds = array<i64: 1, 1, 8>}, {transform_indices = @transform_7, window_bounds = array<i64: 1, 2, 8>}]} {
    %c0 = arith.constant 0 : index
    %c0_0 = arith.constant 0 : index
    %0 = vector.load %arg1[%c0, %c0_0] : memref<16x4xf32, #tpu.memory_space<vmem>>, vector<16x4xf32>
    %c0_1 = arith.constant 0 : index
    %c0_2 = arith.constant 0 : index
    %1 = vector.load %arg2[%c0_1, %c0_2] : memref<4x256xf32, #tpu.memory_space<vmem>>, vector<4x256xf32>
    %c0_3 = arith.constant 0 : index
    %c0_4 = arith.constant 0 : index
    %2 = vector.load %arg3[%c0_3, %c0_4] : memref<1x256xf32, #tpu.memory_space<vmem>>, vector<1x256xf32>
    %c0_5 = arith.constant 0 : index
    %c0_6 = arith.constant 0 : index
    %c0_7 = arith.constant 0 : index
    %3 = vector.load %arg4[%c0_5, %c0_6, %c0_7] : memref<1x256x16xf32, #tpu.memory_space<vmem>>, vector<1x256x16xf32>
    %4 = vector.shape_cast %3 : vector<1x256x16xf32> to vector<256x16xf32>
    %c0_8 = arith.constant 0 : index
    %c0_9 = arith.constant 0 : index
    %c0_10 = arith.constant 0 : index
    %5 = vector.load %arg5[%c0_8, %c0_9, %c0_10] : memref<1x1x16xf32, #tpu.memory_space<vmem>>, vector<1x1x16xf32>
    %6 = vector.shape_cast %5 : vector<1x1x16xf32> to vector<1x16xf32>
    %c0_11 = arith.constant 0 : index
    %c0_12 = arith.constant 0 : index
    %c0_13 = arith.constant 0 : index
    %7 = vector.load %arg6[%c0_11, %c0_12, %c0_13] : memref<1x8x8xf32, #tpu.memory_space<vmem>>, vector<1x8x8xf32>
    %8 = vector.shape_cast %7 : vector<1x8x8xf32> to vector<8x8xf32>
    %c0_14 = arith.constant 0 : index
    %c0_15 = arith.constant 0 : index
    %c0_16 = arith.constant 0 : index
    %9 = vector.load %arg7[%c0_14, %c0_15, %c0_16] : memref<1x1x8xf32, #tpu.memory_space<vmem>>, vector<1x1x8xf32>
    %10 = vector.shape_cast %9 : vector<1x1x8xf32> to vector<1x8xf32>
    %cst = arith.constant dense<0.000000e+00> : vector<16x256xf32>
    %11 = tpu.matmul %0, %1, %cst {dimension_numbers = #tpu.dot_dimension_numbers<[1], [0], [0], [1], [0, 0, 1, 1], [], []>, precision = #tpu.contract_precision<fp32>} : vector<16x4xf32>, vector<4x256xf32>, vector<16x256xf32> -> vector<16x256xf32>
    %12 = vector.broadcast %2 : vector<1x256xf32> to vector<16x256xf32>
    %13 = arith.addf %11, %12 : vector<16x256xf32>
    %14 = math.tanh %13 : vector<16x256xf32>
    %cst_17 = arith.constant dense<0.000000e+00> : vector<16x16xf32>
    %15 = tpu.matmul %14, %4, %cst_17 {dimension_numbers = #tpu.dot_dimension_numbers<[1], [0], [0], [1], [0, 0, 1, 1], [], []>, precision = #tpu.contract_precision<fp32>} : vector<16x256xf32>, vector<256x16xf32>, vector<16x16xf32> -> vector<16x16xf32>
    %16 = vector.broadcast %6 : vector<1x16xf32> to vector<16x16xf32>
    %17 = arith.addf %15, %16 : vector<16x16xf32>
    %cst_18 = arith.constant dense<0.000000e+00> : vector<16xf32>
    %18 = vector.multi_reduction <add>, %17, %cst_18 [1] : vector<16x16xf32> to vector<16xf32>
    %19 = vector.shape_cast %18 : vector<16xf32> to vector<16x1xf32>
    %cst_19 = arith.constant 1.600000e+01 : f32
    %20 = vector.broadcast %cst_19 : f32 to vector<16x1xf32>
    %21 = arith.divf %19, %20 : vector<16x1xf32>
    %22 = vector.broadcast %21 : vector<16x1xf32> to vector<16x16xf32>
    %23 = arith.subf %17, %22 : vector<16x16xf32>
    %cst_20 = arith.constant 0.258198887 : f32
    %24 = vector.broadcast %cst_20 : f32 to vector<16x16xf32>
    %25 = arith.mulf %23, %24 : vector<16x16xf32>
    %cst_21 = arith.constant dense<0.000000e+00> : vector<16x16xf32>
    %26 = tpu.matmul %25, %25, %cst_21 {dimension_numbers = #tpu.dot_dimension_numbers<[1], [1], [0], [0], [0, 0, 1, 0], [], []>, precision = #tpu.contract_precision<fp32>} : vector<16x16xf32>, vector<16x16xf32>, vector<16x16xf32> -> vector<16x16xf32>
    %27 = tpu.iota {dimensions = array<i32: 0>} : vector<8x8xi32>
    %28 = tpu.iota {dimensions = array<i32: 1>} : vector<8x8xi32>
    %29 = arith.cmpi eq, %27, %28 : vector<8x8xi32>
    %30 = arith.extui %29 : vector<8x8xi1> to vector<8x8xi32>
    %31 = arith.sitofp %30 : vector<8x8xi32> to vector<8x8xf32>
    %32 = vector.extract_strided_slice %26 {offsets = [8, 0], sizes = [8, 8], strides = [1, 1]} : vector<16x16xf32> to vector<8x8xf32>
    %33 = vector.extract_strided_slice %26 {offsets = [8, 8], sizes = [8, 8], strides = [1, 1]} : vector<16x16xf32> to vector<8x8xf32>
    %cst_22 = arith.constant 2.000000e-06 : f32
    %34 = vector.broadcast %cst_22 : f32 to vector<8x8xf32>
    %35 = arith.mulf %34, %31 : vector<8x8xf32>
    %36 = arith.addf %33, %35 : vector<8x8xf32>
    %cst_23 = arith.constant 9.99999974E-5 : f32
    %37 = vector.broadcast %cst_23 : f32 to vector<8x8xf32>
    %38 = arith.mulf %37, %31 : vector<8x8xf32>
    %39 = arith.addf %36, %38 : vector<8x8xf32>
    %40 = tpu.concatenate %39, %31 in 1 : vector<8x8xf32>, vector<8x8xf32> -> vector<8x16xf32>
    %41 = tpu.iota {dimensions = array<i32: 0>} : vector<8x1xi32>
    %42 = vector.extract_strided_slice %40 {offsets = [0, 0], sizes = [1, 1], strides = [1, 1]} : vector<8x16xf32> to vector<1x1xf32>
    %43 = vector.extract_strided_slice %40 {offsets = [0, 0], sizes = [1, 16], strides = [1, 1]} : vector<8x16xf32> to vector<1x16xf32>
    %44 = vector.broadcast %42 : vector<1x1xf32> to vector<1x16xf32>
    %45 = arith.divf %43, %44 : vector<1x16xf32>
    %c0_i32 = arith.constant 0 : i32
    %46 = vector.broadcast %c0_i32 : i32 to vector<8x1xi32>
    %47 = arith.cmpi eq, %41, %46 : vector<8x1xi32>
    %48 = vector.extract_strided_slice %40 {offsets = [0, 0], sizes = [8, 1], strides = [1, 1]} : vector<8x16xf32> to vector<8x1xf32>
    %cst_24 = arith.constant 0.000000e+00 : f32
    %49 = vector.broadcast %cst_24 : f32 to vector<8x1xf32>
    %50 = arith.select %47, %49, %48 : vector<8x1xi1>, vector<8x1xf32>
    %51 = vector.broadcast %50 : vector<8x1xf32> to vector<8x16xf32>
    %52 = vector.broadcast %45 : vector<1x16xf32> to vector<8x16xf32>
    %53 = arith.mulf %51, %52 : vector<8x16xf32>
    %54 = arith.subf %40, %53 : vector<8x16xf32>
    %c0_i32_25 = arith.constant 0 : i32
    %55 = vector.broadcast %c0_i32_25 : i32 to vector<8x1xi32>
    %56 = arith.cmpi eq, %41, %55 : vector<8x1xi32>
    %57 = vector.shape_cast %56 : vector<8x1xi1> to vector<8x1xi1>
    %58 = vector.broadcast %57 : vector<8x1xi1> to vector<8x16xi1>
    %59 = vector.shape_cast %45 : vector<1x16xf32> to vector<1x16xf32>
    %60 = vector.broadcast %59 : vector<1x16xf32> to vector<8x16xf32>
    %61 = arith.select %58, %60, %54 : vector<8x16xi1>, vector<8x16xf32>
    %62 = vector.extract_strided_slice %61 {offsets = [1, 1], sizes = [1, 1], strides = [1, 1]} : vector<8x16xf32> to vector<1x1xf32>
    %63 = vector.extract_strided_slice %61 {offsets = [1, 0], sizes = [1, 16], strides = [1, 1]} : vector<8x16xf32> to vector<1x16xf32>
    %64 = vector.broadcast %62 : vector<1x1xf32> to vector<1x16xf32>
    %65 = arith.divf %63, %64 : vector<1x16xf32>
    %c1_i32 = arith.constant 1 : i32
    %66 = vector.broadcast %c1_i32 : i32 to vector<8x1xi32>
    %67 = arith.cmpi eq, %41, %66 : vector<8x1xi32>
    %68 = vector.extract_strided_slice %61 {offsets = [0, 1], sizes = [8, 1], strides = [1, 1]} : vector<8x16xf32> to vector<8x1xf32>
    %cst_26 = arith.constant 0.000000e+00 : f32
    %69 = vector.broadcast %cst_26 : f32 to vector<8x1xf32>
    %70 = arith.select %67, %69, %68 : vector<8x1xi1>, vector<8x1xf32>
    %71 = vector.broadcast %70 : vector<8x1xf32> to vector<8x16xf32>
    %72 = vector.broadcast %65 : vector<1x16xf32> to vector<8x16xf32>
    %73 = arith.mulf %71, %72 : vector<8x16xf32>
    %74 = arith.subf %61, %73 : vector<8x16xf32>
    %c1_i32_27 = arith.constant 1 : i32
    %75 = vector.broadcast %c1_i32_27 : i32 to vector<8x1xi32>
    %76 = arith.cmpi eq, %41, %75 : vector<8x1xi32>
    %77 = vector.shape_cast %76 : vector<8x1xi1> to vector<8x1xi1>
    %78 = vector.broadcast %77 : vector<8x1xi1> to vector<8x16xi1>
    %79 = vector.shape_cast %65 : vector<1x16xf32> to vector<1x16xf32>
    %80 = vector.broadcast %79 : vector<1x16xf32> to vector<8x16xf32>
    %81 = arith.select %78, %80, %74 : vector<8x16xi1>, vector<8x16xf32>
    %82 = vector.extract_strided_slice %81 {offsets = [2, 2], sizes = [1, 1], strides = [1, 1]} : vector<8x16xf32> to vector<1x1xf32>
    %83 = vector.extract_strided_slice %81 {offsets = [2, 0], sizes = [1, 16], strides = [1, 1]} : vector<8x16xf32> to vector<1x16xf32>
    %84 = vector.broadcast %82 : vector<1x1xf32> to vector<1x16xf32>
    %85 = arith.divf %83, %84 : vector<1x16xf32>
    %c2_i32 = arith.constant 2 : i32
    %86 = vector.broadcast %c2_i32 : i32 to vector<8x1xi32>
    %87 = arith.cmpi eq, %41, %86 : vector<8x1xi32>
    %88 = vector.extract_strided_slice %81 {offsets = [0, 2], sizes = [8, 1], strides = [1, 1]} : vector<8x16xf32> to vector<8x1xf32>
    %cst_28 = arith.constant 0.000000e+00 : f32
    %89 = vector.broadcast %cst_28 : f32 to vector<8x1xf32>
    %90 = arith.select %87, %89, %88 : vector<8x1xi1>, vector<8x1xf32>
    %91 = vector.broadcast %90 : vector<8x1xf32> to vector<8x16xf32>
    %92 = vector.broadcast %85 : vector<1x16xf32> to vector<8x16xf32>
    %93 = arith.mulf %91, %92 : vector<8x16xf32>
    %94 = arith.subf %81, %93 : vector<8x16xf32>
    %c2_i32_29 = arith.constant 2 : i32
    %95 = vector.broadcast %c2_i32_29 : i32 to vector<8x1xi32>
    %96 = arith.cmpi eq, %41, %95 : vector<8x1xi32>
    %97 = vector.shape_cast %96 : vector<8x1xi1> to vector<8x1xi1>
    %98 = vector.broadcast %97 : vector<8x1xi1> to vector<8x16xi1>
    %99 = vector.shape_cast %85 : vector<1x16xf32> to vector<1x16xf32>
    %100 = vector.broadcast %99 : vector<1x16xf32> to vector<8x16xf32>
    %101 = arith.select %98, %100, %94 : vector<8x16xi1>, vector<8x16xf32>
    %102 = vector.extract_strided_slice %101 {offsets = [3, 3], sizes = [1, 1], strides = [1, 1]} : vector<8x16xf32> to vector<1x1xf32>
    %103 = vector.extract_strided_slice %101 {offsets = [3, 0], sizes = [1, 16], strides = [1, 1]} : vector<8x16xf32> to vector<1x16xf32>
    %104 = vector.broadcast %102 : vector<1x1xf32> to vector<1x16xf32>
    %105 = arith.divf %103, %104 : vector<1x16xf32>
    %c3_i32 = arith.constant 3 : i32
    %106 = vector.broadcast %c3_i32 : i32 to vector<8x1xi32>
    %107 = arith.cmpi eq, %41, %106 : vector<8x1xi32>
    %108 = vector.extract_strided_slice %101 {offsets = [0, 3], sizes = [8, 1], strides = [1, 1]} : vector<8x16xf32> to vector<8x1xf32>
    %cst_30 = arith.constant 0.000000e+00 : f32
    %109 = vector.broadcast %cst_30 : f32 to vector<8x1xf32>
    %110 = arith.select %107, %109, %108 : vector<8x1xi1>, vector<8x1xf32>
    %111 = vector.broadcast %110 : vector<8x1xf32> to vector<8x16xf32>
    %112 = vector.broadcast %105 : vector<1x16xf32> to vector<8x16xf32>
    %113 = arith.mulf %111, %112 : vector<8x16xf32>
    %114 = arith.subf %101, %113 : vector<8x16xf32>
    %c3_i32_31 = arith.constant 3 : i32
    %115 = vector.broadcast %c3_i32_31 : i32 to vector<8x1xi32>
    %116 = arith.cmpi eq, %41, %115 : vector<8x1xi32>
    %117 = vector.shape_cast %116 : vector<8x1xi1> to vector<8x1xi1>
    %118 = vector.broadcast %117 : vector<8x1xi1> to vector<8x16xi1>
    %119 = vector.shape_cast %105 : vector<1x16xf32> to vector<1x16xf32>
    %120 = vector.broadcast %119 : vector<1x16xf32> to vector<8x16xf32>
    %121 = arith.select %118, %120, %114 : vector<8x16xi1>, vector<8x16xf32>
    %122 = vector.extract_strided_slice %121 {offsets = [4, 4], sizes = [1, 1], strides = [1, 1]} : vector<8x16xf32> to vector<1x1xf32>
    %123 = vector.extract_strided_slice %121 {offsets = [4, 0], sizes = [1, 16], strides = [1, 1]} : vector<8x16xf32> to vector<1x16xf32>
    %124 = vector.broadcast %122 : vector<1x1xf32> to vector<1x16xf32>
    %125 = arith.divf %123, %124 : vector<1x16xf32>
    %c4_i32 = arith.constant 4 : i32
    %126 = vector.broadcast %c4_i32 : i32 to vector<8x1xi32>
    %127 = arith.cmpi eq, %41, %126 : vector<8x1xi32>
    %128 = vector.extract_strided_slice %121 {offsets = [0, 4], sizes = [8, 1], strides = [1, 1]} : vector<8x16xf32> to vector<8x1xf32>
    %cst_32 = arith.constant 0.000000e+00 : f32
    %129 = vector.broadcast %cst_32 : f32 to vector<8x1xf32>
    %130 = arith.select %127, %129, %128 : vector<8x1xi1>, vector<8x1xf32>
    %131 = vector.broadcast %130 : vector<8x1xf32> to vector<8x16xf32>
    %132 = vector.broadcast %125 : vector<1x16xf32> to vector<8x16xf32>
    %133 = arith.mulf %131, %132 : vector<8x16xf32>
    %134 = arith.subf %121, %133 : vector<8x16xf32>
    %c4_i32_33 = arith.constant 4 : i32
    %135 = vector.broadcast %c4_i32_33 : i32 to vector<8x1xi32>
    %136 = arith.cmpi eq, %41, %135 : vector<8x1xi32>
    %137 = vector.shape_cast %136 : vector<8x1xi1> to vector<8x1xi1>
    %138 = vector.broadcast %137 : vector<8x1xi1> to vector<8x16xi1>
    %139 = vector.shape_cast %125 : vector<1x16xf32> to vector<1x16xf32>
    %140 = vector.broadcast %139 : vector<1x16xf32> to vector<8x16xf32>
    %141 = arith.select %138, %140, %134 : vector<8x16xi1>, vector<8x16xf32>
    %142 = vector.extract_strided_slice %141 {offsets = [5, 5], sizes = [1, 1], strides = [1, 1]} : vector<8x16xf32> to vector<1x1xf32>
    %143 = vector.extract_strided_slice %141 {offsets = [5, 0], sizes = [1, 16], strides = [1, 1]} : vector<8x16xf32> to vector<1x16xf32>
    %144 = vector.broadcast %142 : vector<1x1xf32> to vector<1x16xf32>
    %145 = arith.divf %143, %144 : vector<1x16xf32>
    %c5_i32 = arith.constant 5 : i32
    %146 = vector.broadcast %c5_i32 : i32 to vector<8x1xi32>
    %147 = arith.cmpi eq, %41, %146 : vector<8x1xi32>
    %148 = vector.extract_strided_slice %141 {offsets = [0, 5], sizes = [8, 1], strides = [1, 1]} : vector<8x16xf32> to vector<8x1xf32>
    %cst_34 = arith.constant 0.000000e+00 : f32
    %149 = vector.broadcast %cst_34 : f32 to vector<8x1xf32>
    %150 = arith.select %147, %149, %148 : vector<8x1xi1>, vector<8x1xf32>
    %151 = vector.broadcast %150 : vector<8x1xf32> to vector<8x16xf32>
    %152 = vector.broadcast %145 : vector<1x16xf32> to vector<8x16xf32>
    %153 = arith.mulf %151, %152 : vector<8x16xf32>
    %154 = arith.subf %141, %153 : vector<8x16xf32>
    %c5_i32_35 = arith.constant 5 : i32
    %155 = vector.broadcast %c5_i32_35 : i32 to vector<8x1xi32>
    %156 = arith.cmpi eq, %41, %155 : vector<8x1xi32>
    %157 = vector.shape_cast %156 : vector<8x1xi1> to vector<8x1xi1>
    %158 = vector.broadcast %157 : vector<8x1xi1> to vector<8x16xi1>
    %159 = vector.shape_cast %145 : vector<1x16xf32> to vector<1x16xf32>
    %160 = vector.broadcast %159 : vector<1x16xf32> to vector<8x16xf32>
    %161 = arith.select %158, %160, %154 : vector<8x16xi1>, vector<8x16xf32>
    %162 = vector.extract_strided_slice %161 {offsets = [6, 6], sizes = [1, 1], strides = [1, 1]} : vector<8x16xf32> to vector<1x1xf32>
    %163 = vector.extract_strided_slice %161 {offsets = [6, 0], sizes = [1, 16], strides = [1, 1]} : vector<8x16xf32> to vector<1x16xf32>
    %164 = vector.broadcast %162 : vector<1x1xf32> to vector<1x16xf32>
    %165 = arith.divf %163, %164 : vector<1x16xf32>
    %c6_i32 = arith.constant 6 : i32
    %166 = vector.broadcast %c6_i32 : i32 to vector<8x1xi32>
    %167 = arith.cmpi eq, %41, %166 : vector<8x1xi32>
    %168 = vector.extract_strided_slice %161 {offsets = [0, 6], sizes = [8, 1], strides = [1, 1]} : vector<8x16xf32> to vector<8x1xf32>
    %cst_36 = arith.constant 0.000000e+00 : f32
    %169 = vector.broadcast %cst_36 : f32 to vector<8x1xf32>
    %170 = arith.select %167, %169, %168 : vector<8x1xi1>, vector<8x1xf32>
    %171 = vector.broadcast %170 : vector<8x1xf32> to vector<8x16xf32>
    %172 = vector.broadcast %165 : vector<1x16xf32> to vector<8x16xf32>
    %173 = arith.mulf %171, %172 : vector<8x16xf32>
    %174 = arith.subf %161, %173 : vector<8x16xf32>
    %c6_i32_37 = arith.constant 6 : i32
    %175 = vector.broadcast %c6_i32_37 : i32 to vector<8x1xi32>
    %176 = arith.cmpi eq, %41, %175 : vector<8x1xi32>
    %177 = vector.shape_cast %176 : vector<8x1xi1> to vector<8x1xi1>
    %178 = vector.broadcast %177 : vector<8x1xi1> to vector<8x16xi1>
    %179 = vector.shape_cast %165 : vector<1x16xf32> to vector<1x16xf32>
    %180 = vector.broadcast %179 : vector<1x16xf32> to vector<8x16xf32>
    %181 = arith.select %178, %180, %174 : vector<8x16xi1>, vector<8x16xf32>
    %182 = vector.extract_strided_slice %181 {offsets = [7, 7], sizes = [1, 1], strides = [1, 1]} : vector<8x16xf32> to vector<1x1xf32>
    %183 = vector.extract_strided_slice %181 {offsets = [7, 0], sizes = [1, 16], strides = [1, 1]} : vector<8x16xf32> to vector<1x16xf32>
    %184 = vector.broadcast %182 : vector<1x1xf32> to vector<1x16xf32>
    %185 = arith.divf %183, %184 : vector<1x16xf32>
    %c7_i32 = arith.constant 7 : i32
    %186 = vector.broadcast %c7_i32 : i32 to vector<8x1xi32>
    %187 = arith.cmpi eq, %41, %186 : vector<8x1xi32>
    %188 = vector.extract_strided_slice %181 {offsets = [0, 7], sizes = [8, 1], strides = [1, 1]} : vector<8x16xf32> to vector<8x1xf32>
    %cst_38 = arith.constant 0.000000e+00 : f32
    %189 = vector.broadcast %cst_38 : f32 to vector<8x1xf32>
    %190 = arith.select %187, %189, %188 : vector<8x1xi1>, vector<8x1xf32>
    %191 = vector.broadcast %190 : vector<8x1xf32> to vector<8x16xf32>
    %192 = vector.broadcast %185 : vector<1x16xf32> to vector<8x16xf32>
    %193 = arith.mulf %191, %192 : vector<8x16xf32>
    %194 = arith.subf %181, %193 : vector<8x16xf32>
    %c7_i32_39 = arith.constant 7 : i32
    %195 = vector.broadcast %c7_i32_39 : i32 to vector<8x1xi32>
    %196 = arith.cmpi eq, %41, %195 : vector<8x1xi32>
    %197 = vector.shape_cast %196 : vector<8x1xi1> to vector<8x1xi1>
    %198 = vector.broadcast %197 : vector<8x1xi1> to vector<8x16xi1>
    %199 = vector.shape_cast %185 : vector<1x16xf32> to vector<1x16xf32>
    %200 = vector.broadcast %199 : vector<1x16xf32> to vector<8x16xf32>
    %201 = arith.select %198, %200, %194 : vector<8x16xi1>, vector<8x16xf32>
    %202 = vector.extract_strided_slice %201 {offsets = [0, 8], sizes = [8, 8], strides = [1, 1]} : vector<8x16xf32> to vector<8x8xf32>
    %cst_40 = arith.constant dense<0.000000e+00> : vector<8x8xf32>
    %203 = tpu.matmul %202, %32, %cst_40 {dimension_numbers = #tpu.dot_dimension_numbers<[1], [0], [0], [1], [0, 0, 1, 1], [], []>, precision = #tpu.contract_precision<fp32>} : vector<8x8xf32>, vector<8x8xf32>, vector<8x8xf32> -> vector<8x8xf32>
    %cst_41 = arith.constant dense<0.000000e+00> : vector<1x8xf32>
    %204 = tpu.matmul %10, %203, %cst_41 {dimension_numbers = #tpu.dot_dimension_numbers<[1], [0], [0], [1], [0, 0, 1, 1], [], []>, precision = #tpu.contract_precision<fp32>} : vector<1x8xf32>, vector<8x8xf32>, vector<1x8xf32> -> vector<1x8xf32>
    %cst_42 = arith.constant dense<0.000000e+00> : vector<8x8xf32>
    %205 = tpu.matmul %8, %8, %cst_42 {dimension_numbers = #tpu.dot_dimension_numbers<[1], [1], [0], [0], [0, 0, 1, 0], [], []>, precision = #tpu.contract_precision<fp32>} : vector<8x8xf32>, vector<8x8xf32>, vector<8x8xf32> -> vector<8x8xf32>
    %206 = arith.subf %205, %36 : vector<8x8xf32>
    %cst_43 = arith.constant dense<0.000000e+00> : vector<8x8xf32>
    %207 = tpu.matmul %206, %203, %cst_43 {dimension_numbers = #tpu.dot_dimension_numbers<[1], [0], [0], [1], [0, 0, 1, 1], [], []>, precision = #tpu.contract_precision<fp32>} : vector<8x8xf32>, vector<8x8xf32>, vector<8x8xf32> -> vector<8x8xf32>
    %208 = arith.mulf %203, %207 : vector<8x8xf32>
    %cst_44 = arith.constant dense<0.000000e+00> : vector<8xf32>
    %209 = vector.multi_reduction <add>, %208, %cst_44 [0] : vector<8x8xf32> to vector<8xf32>
    %210 = vector.shape_cast %209 : vector<8xf32> to vector<1x8xf32>
    %211 = vector.extract_strided_slice %25 {offsets = [0, 0], sizes = [8, 16], strides = [1, 1]} : vector<16x16xf32> to vector<8x16xf32>
    %212 = arith.mulf %211, %211 : vector<8x16xf32>
    %cst_45 = arith.constant dense<0.000000e+00> : vector<8xf32>
    %213 = vector.multi_reduction <add>, %212, %cst_45 [1] : vector<8x16xf32> to vector<8xf32>
    %214 = vector.shape_cast %213 : vector<8xf32> to vector<8x1xf32>
    %cst_46 = arith.constant 2.000000e-06 : f32
    %215 = vector.broadcast %cst_46 : f32 to vector<8x1xf32>
    %216 = arith.addf %214, %215 : vector<8x1xf32>
    %217 = tpu.iota {dimensions = array<i32: 0>} : vector<8x8xi32>
    %218 = tpu.iota {dimensions = array<i32: 1>} : vector<8x8xi32>
    %219 = arith.cmpi eq, %217, %218 : vector<8x8xi32>
    %220 = arith.extui %219 : vector<8x8xi1> to vector<8x8xi32>
    %221 = arith.sitofp %220 : vector<8x8xi32> to vector<8x8xf32>
    %cst_47 = arith.constant dense<0.000000e+00> : vector<1x8xf32>
    %222 = tpu.matmul %216, %221, %cst_47 {dimension_numbers = #tpu.dot_dimension_numbers<[0], [0], [1], [1], [0, 1, 1, 1], [], []>, precision = #tpu.contract_precision<fp32>} : vector<8x1xf32>, vector<8x8xf32>, vector<1x8xf32> -> vector<1x8xf32>
    %c0_48 = arith.constant 0 : index
    %c0_49 = arith.constant 0 : index
    %c0_50 = arith.constant 0 : index
    %223 = vector.load %arg8[%c0_48, %c0_49, %c0_50] : memref<1x2x8xf32, #tpu.memory_space<vmem>>, vector<1x1x8xf32>
    %224 = vector.shape_cast %223 : vector<1x1x8xf32> to vector<1x8xf32>
    %225 = vector.shape_cast %204 : vector<1x8xf32> to vector<1x1x8xf32>
    tpu.vector_store %arg8[%c0_48, %c0_49, %c0_50], %225 {strides = array<i32>} : memref<1x2x8xf32, #tpu.memory_space<vmem>>, vector<1x1x8xf32>,
    %226 = arith.addf %222, %210 : vector<1x8xf32>
    %c0_51 = arith.constant 0 : index
    %c1 = arith.constant 1 : index
    %c0_52 = arith.constant 0 : index
    %227 = vector.load %arg8[%c0_51, %c1, %c0_52] : memref<1x2x8xf32, #tpu.memory_space<vmem>>, vector<1x1x8xf32>
    %228 = vector.shape_cast %227 : vector<1x1x8xf32> to vector<1x8xf32>
    %229 = vector.shape_cast %226 : vector<1x8xf32> to vector<1x1x8xf32>
    tpu.vector_store %arg8[%c0_51, %c1, %c0_52], %229 {strides = array<i32>} : memref<1x2x8xf32, #tpu.memory_space<vmem>>, vector<1x1x8xf32>,
    return
  }
  func.func @transform_0(%arg0: i32) -> (i32, i32) {
    %c0_i32 = arith.constant 0 : i32
    %c0_i32_0 = arith.constant 0 : i32
    %c0_i32_1 = arith.constant 0 : i32
    return %c0_i32, %c0_i32_0 : i32, i32
  }
  func.func @transform_1(%arg0: i32) -> (i32, i32) {
    %c0_i32 = arith.constant 0 : i32
    %c0_i32_0 = arith.constant 0 : i32
    %c0_i32_1 = arith.constant 0 : i32
    return %c0_i32, %c0_i32_0 : i32, i32
  }
  func.func @transform_2(%arg0: i32) -> (i32, i32) {
    %c0_i32 = arith.constant 0 : i32
    %c0_i32_0 = arith.constant 0 : i32
    %c0_i32_1 = arith.constant 0 : i32
    return %c0_i32, %c0_i32_0 : i32, i32
  }
  func.func @transform_3(%arg0: i32) -> (i32, i32, i32) {
    %c0_i32 = arith.constant 0 : i32
    %c0_i32_0 = arith.constant 0 : i32
    %c0_i32_1 = arith.constant 0 : i32
    return %arg0, %c0_i32, %c0_i32_0 : i32, i32, i32
  }
  func.func @transform_4(%arg0: i32) -> (i32, i32, i32) {
    %c0_i32 = arith.constant 0 : i32
    %c0_i32_0 = arith.constant 0 : i32
    %c0_i32_1 = arith.constant 0 : i32
    return %arg0, %c0_i32, %c0_i32_0 : i32, i32, i32
  }
  func.func @transform_5(%arg0: i32) -> (i32, i32, i32) {
    %c0_i32 = arith.constant 0 : i32
    %c0_i32_0 = arith.constant 0 : i32
    %c0_i32_1 = arith.constant 0 : i32
    return %arg0, %c0_i32, %c0_i32_0 : i32, i32, i32
  }
  func.func @transform_6(%arg0: i32) -> (i32, i32, i32) {
    %c0_i32 = arith.constant 0 : i32
    %c0_i32_0 = arith.constant 0 : i32
    %c0_i32_1 = arith.constant 0 : i32
    return %arg0, %c0_i32, %c0_i32_0 : i32, i32, i32
  }
  func.func @transform_7(%arg0: i32) -> (i32, i32, i32) {
    %c0_i32 = arith.constant 0 : i32
    %c0_i32_0 = arith.constant 0 : i32
    %c0_i32_1 = arith.constant 0 : i32
    return %arg0, %c0_i32, %c0_i32_0 : i32, i32, i32
  }
}

</mosaic_0001>

<bundles_post_ra>
// kernel: vip_layer_inducing_forward.1
= control target key start
LH: loop header
LB: loop body
LE: loop exit
PB: predicated region body
PF: predicated region fallthrough
CT: control target
= control target key end

     0   :  { %s5881_s24 = smov 0   ;;  %s6577_s0 = inlined_call_operand.vmem [shape: f32[16,4], index: 0, kind: input, shape index: {}]   ;;  %s6578_s1 = inlined_call_operand.vmem [shape: f32[4,256], index: 1, kind: input, shape index: {}]   ;;  %s6579_s2 = inlined_call_operand.vmem [shape: f32[1,256], index: 2, kind: input, shape index: {}]   ;;  %s6580_s3 = inlined_call_operand.vmem [shape: f32[2,256,16], index: 3, kind: input, shape index: {}]   ;;  %s6581_s4 = inlined_call_operand.vmem [shape: f32[2,1,16], index: 4, kind: input, shape index: {}]   ;;  %s6582_s5 = inlined_call_operand.vmem [shape: f32[2,8,8], index: 5, kind: input, shape index: {}]   ;;  %s6583_s6 = inlined_call_operand.vmem [shape: f32[2,1,8], index: 6, kind: input, shape index: {}]   ;;  %s6584_s7 = inlined_call_operand.vmem [shape: f32[2,2,8], index: 7, kind: output, shape index: {}]  }
   0x1 LB: > { %s4940_s25 = sadd.s32 4294967295, %s5826_s24   ;;  %p4944_p0 = scmp.ge.s32.totalorder %s5826_s24, 1  ;;  %s5826_s24 = sphi %s5881_s24, %s17_s24  }
   0x2   : > { %p262_p1 = scmp.lt.s32.totalorder %s5826_s24, 3 }
   0x4   : > { %p263_p2 = pnand %p4944_p0, %p262_p1 }
   0x6   : > { %266 = sbr.rel (%p263_p2) target bundleno = 3043 (0xbe3), region = 48 }
   0xd   : > { %v324_v0 = vld [vmem:[%s6578_s1] sm:$0xff]  ;;  %vm381_vm0 = vcmask 1043456   ;;  %vm374_vm1 = vcmask 31744   ;;  %v323_v2 = vld [vmem:[%s6577_s0 + $0x8] sm:$0xff]  ;;  %v6585_v5 = vmov 0.0   ;;  %p303_p3 = scmp.lt.s32.totalorder %s4940_s25, 1 }
   0xe   : > { %v322_v1 = vld [vmem:[%s6577_s0] sm:$0xff]  ;;  %v373_v3 = vcombine.high %v324_v0, %v324_v0  ;;  %v382_v4 = vsel %vm381_vm0, %v324_v0, 0  ;;  %452 = vmatprep.mubr.f32.mxu0 %v6585_v5  ;;  %v379_v7 = vsel %vm374_vm1, %v323_v2, 0  ;;  %vm1828_vm2 = vcmask 130048   ;;  %s5829_s18 = smov 8   ;;  %s5831_s19 = smov 120  }
   0xf   : > { %v376_v6 = vsel %vm374_vm1, %v322_v1, 0  ;;  %v5899_v8 = vand.u32 4294901760, %v382_v4  ;;  %v5903_v10 = vand.u32 4294901760, %v379_v7  ;;  %s6634_s25 = smov (!%p303_p3, %s4940_s25), 1  ;;  %vm2371_vm4 = vcmask 64512  }
  0x10   : > { %v5901_v9 = vand.u32 4294901760, %v376_v6  ;;  %v384_v11 = vsel %vm381_vm0, %v373_v3, 0  ;;  %s4956_s9 = sshll.u32 %s6634_s25, 8  ;;  %s310_s17 = scalar_lea.vmem %s6581_s4, %s6634_s25  ;;  %vm5839_vm13 = vmmov 0   ;;  %vm4373_vm14 = vcmask 57344  }
  0x11   : > { %v5907_v12 = vand.u32 4294901760, %v384_v11  ;;  %v5910_v13 = vsub.f32 %v382_v4, %v5899_v8  ;;  %v5914_v15 = vsub.f32 %v379_v7, %v5903_v10  ;;  %s5924_s12 = scalar_lea.vmem %s6580_s3, %s4956_s9  ;;  %s4947_s20 = sshll.u32 %s6634_s25, 3 }
  0x12   : > { %v454_v14 = vsub.f32 %v376_v6, %v5901_v9  ;;  %v342_v24 = vld [vmem:[%s5924_s12 + $0x80] sm:$0xff]  ;;  %v343_v25 = vld [vmem:[%s5924_s12 + $0x88] sm:$0xff]  ;;  %v344_v33 = vld [vmem:[%s5924_s12 + $0x90] sm:$0xff]  ;;  %s314_s23 = scalar_lea.vmem %s6582_s5, %s4947_s20  ;;  %s317_s28 = scalar_lea.vmem %s6583_s6, %s6634_s25 }
  0x13   : > { %387 = vmatprep.subr.mxu0 %v5907_v12  ;;  %v476_v17 = vsub.f32 %v384_v11, %v5907_v12  ;;  %v483_v18 = vand.u32 4294901760, %v5910_v13  ;;  %v466_v19 = vand.u32 4294901760, %v5914_v15  ;;  %v326_v26 = vld [vmem:[%s5924_s12] sm:$0xff]  ;;  %v327_v27 = vld [vmem:[%s5924_s12 + $0x8] sm:$0xff]  ;;  %v959_v31 = vand.u32 4294901760, %v342_v24  ;;  %v345_v34 = vld [vmem:[%s5924_s12 + $0x98] sm:$0xff] }
  0x14   : > { %v455_v16 = vand.u32 4294901760, %v454_v14  ;;  %389 = vmatpush1.msra.mxu0 %v5899_v8  ;;  %v962_v32 = vand.u32 4294901760, %v343_v25  ;;  %v911_v37 = vand.u32 4294901760, %v326_v26  ;;  %v914_v38 = vand.u32 4294901760, %v327_v27  ;;  %v328_v39 = vld [vmem:[%s5924_s12 + $0x10] sm:$0xff]  ;;  %v329_v40 = vld [vmem:[%s5924_s12 + $0x18] sm:$0xff] }
  0x15   : > { %v477_v21 = vand.u32 4294901760, %v476_v17  ;;  %v484_v22 = vsub.f32 %v5910_v13, %v483_v18  ;;  %v467_v23 = vsub.f32 %v5914_v15, %v466_v19  ;;  %v965_v42 = vand.u32 4294901760, %v344_v33  ;;  %v346_v52 = vld [vmem:[%s5924_s12 + $0xa0] sm:$0xff]  ;;  %v347_v53 = vld [vmem:[%s5924_s12 + $0xa8] sm:$0xff]  ;;  %v5986_v62 = vld [vmem:[%s5924_s12 + $0xb0] sm:$0xff]  ;;  %s4948_s29 = sshll.u32 %s6634_s25, 1 }
  0x16   : > { %v456_v20 = vsub.f32 %v454_v14, %v455_v16  ;;  %v5938_v41 = vpack.c.bf16 %v962_v32, %v959_v31  ;;  %v968_v43 = vand.u32 4294901760, %v345_v34  ;;  %v5940_v44 = vpack.c.bf16 %v914_v38, %v911_v37  ;;  %v330_v60 = vld [vmem:[%s5924_s12 + $0x20] sm:$0xff]  ;;  %v331_v61 = vld [vmem:[%s5924_s12 + $0x28] sm:$0xff]  ;;  %v5989_v63 = vld [vmem:[%s5924_s12 + $0xb8] sm:$0xff]  ;;  %s321_s9 = scalar_lea.vmem %s6584_s7, %s4948_s29 }
  0x17   : > { %v478_v29 = vsub.f32 %v476_v17, %v477_v21  ;;  %v485_v30 = vand.u32 4294901760, %v484_v22  ;;  %v468_v36 = vand.u32 4294901760, %v467_v23  ;;  %v917_v45 = vand.u32 4294901760, %v328_v39 }
  0x18   : > { %v457_v28 = vand.u32 4294901760, %v456_v20  ;;  %5462 = vmatprep.subr.bf16.mxu1 %v5938_v41  ;;  %v920_v46 = vand.u32 4294901760, %v329_v40  ;;  %v5943_v47 = vpack.c.bf16 %v968_v43, %v965_v42  ;;  %v5963_v49 = vsub.f32 %v342_v24, %v959_v31  ;;  %v332_v20 = vld [vmem:[%s5924_s12 + $0x30] sm:$0xff] }
  0x19   : > { %v479_v35 = vand.u32 4294901760, %v478_v29  ;;  %5464 = vmatpush3.bf16.msra.mxu1 %v5940_v44  ;;  %v5965_v50 = vsub.f32 %v343_v25, %v962_v32  ;;  %v5973_v54 = vsub.f32 %v326_v26, %v911_v37  ;;  %v5975_v55 = vsub.f32 %v327_v27, %v914_v38  ;;  %v351_v26 = vld [vmem:[%s5924_s12 + $0xc8] sm:$0xff]  ;;  %v334_v29 = vld [vmem:[%s5924_s12 + $0x40] sm:$0xff] }
  0x1a   : > { %458 = vmatmul.mubr.f32.vlgmr.msra.gmra.mrb[0].mxu0 %v457_v28  ;;  %5466 = vmatprep.subr.bf16.mxu1 %v5943_v47  ;;  %v5948_v48 = vpack.c.bf16 %v920_v46, %v917_v45  ;;  %v5979_v56 = vsub.f32 %v344_v33, %v965_v42  ;;  %v5981_v57 = vsub.f32 %v345_v34, %v968_v43  ;;  %v971_v58 = vand.u32 4294901760, %v346_v52  ;;  %v353_v42 = vld [vmem:[%s5924_s12 + $0xd8] sm:$0xff] }
  0x1b   : > { %463 = vmatprep.mubr.f32.mxu0 %v6585_v5  ;;  %480 = vmatprep.subr.mxu0 %v479_v35  ;;  %v5525_v51 = vpack.c.bf16 %v5965_v50, %v5963_v49  ;;  %v974_v59 = vand.u32 4294901760, %v347_v53  ;;  %v5527_v0 = vpack.c.bf16 %v5975_v55, %v5973_v54  ;;  %v5994_v1 = vsub.f32 %v328_v39, %v917_v45 }
  0x1c   : > { %486 = vmatpush1.msra.mxu0 %v485_v30  ;;  %v5529_v2 = vpack.c.bf16 %v5981_v57, %v5979_v56  ;;  %v5999_v3 = vsub.f32 %v329_v40, %v920_v46  ;;  %v923_v4 = vand.u32 4294901760, %v330_v60  ;;  %v926_v6 = vand.u32 4294901760, %v331_v61  ;;  %v335_v30 = vld [vmem:[%s5924_s12 + $0x48] sm:$0xff]  ;;  %v352_v40 = vld [vmem:[%s5924_s12 + $0xd0] sm:$0xff] }
  0x1d   : > { %566 = vmatprep.subr.mxu0 %v476_v17  ;;  %5468 = vmatpush3.bf16.msra.mxu1 %v5948_v48  ;;  %v6001_v7 = vsub.f32 %v346_v52, %v971_v58  ;;  %v977_v11 = vand.u32 4294901760, %v5986_v62  ;;  %v929_v22 = vand.u32 4294901760, %v332_v20  ;;  %v986_v28 = vand.u32 4294901760, %v351_v26  ;;  %v337_v52 = vld [vmem:[%s5924_s12 + $0x58] sm:$0xff] }
  0x1e   : > { %469 = vmatmul.mubr.f32.gmra.mrb[2].mxu0 %v468_v36  ;;  %v935_v32 = vand.u32 4294901760, %v334_v29  ;;  %v938_v33 = vand.u32 4294901760, %v335_v30  ;;  %v6040_v34 = vpack.c.bf16 %v974_v59, %v971_v58  ;;  %v6046_v37 = vpack.c.bf16 %v926_v6, %v923_v4 }
  0x1f   : > { %549 = vmatprep.mubr.f32.mxu0 %v6585_v5  ;;  %v6018_v17 = vsub.f32 %v5986_v62, %v977_v11  ;;  %v6030_v24 = vsub.f32 %v332_v20, %v929_v22  ;;  %v6044_v36 = vsub.f32 %v351_v26, %v986_v28  ;;  %v989_v45 = vand.u32 4294901760, %v352_v40 }
  0x20   : > { %v6048_v38 = vsub.f32 %v334_v29, %v935_v32  ;;  %v6050_v39 = vsub.f32 %v335_v30, %v938_v33  ;;  %5470 = vmatprep.subr.bf16.mxu1 %v6040_v34  ;;  %v992_v46 = vand.u32 4294901760, %v353_v42  ;;  %v6090_v26 = vpack.c.bf16 %v938_v33, %v935_v32 }
  0x21   : > { %5472 = vmatpush3.bf16.msra.mxu1 %v6046_v37 }
  0x22   : > { %551 = vmatmul.mubr.f32.vlgmr.msra.gmra.mrb[0].mxu0 %v5901_v9  ;;  %v6066_v62 = vsub.f32 %v353_v42, %v992_v46  ;;  %6609 = vst [vmem:[#allocation2_spill] sm:$0xff] %v6090_v26 }
  0x23   : > { %556 = vmatprep.mubr.f32.mxu0 %v6585_v5  ;;  %569 = vmatpush1.msra.mxu0 %v5910_v13  ;;  %v5531_v13 = vpack.c.bf16 %v5999_v3, %v5994_v1 }
  0x24   : > { %650 = vmatprep.subr.mxu0 %v5907_v12 }
  0x26   : > { %558 = vmatmul.mubr.f32.gmra.mrb[2].mxu0 %v5903_v10 }
  0x27   : > { %632 = vmatprep.mubr.f32.mxu0 %v6585_v5 }
  0x2a   : > { %635 = vmatmul.mubr.f32.vlgmr.msra.gmra.mrb[0].mxu0 %v454_v14  ;;  %v6011_v14 = vsub.f32 %v330_v60, %v923_v4  ;;  %v354_v4 = vld [vmem:[%s5924_s12 + $0xe0] sm:$0xff] }
  0x2b   : > { %640 = vmatprep.mubr.f32.mxu0 %v6585_v5  ;;  %652 = vmatpush1.msra.mxu0 %v5899_v8 }
  0x2c   : > { %737 = vmatprep.subr.mxu0 %v477_v21  ;;  %v333_v21 = vld [vmem:[%s5924_s12 + $0x38] sm:$0xff] }
  0x2d   : > { %v932_v23 = vand.u32 4294901760, %v333_v21 }
  0x2e   : > { %643 = vmatmul.mubr.f32.gmra.mrb[2].mxu0 %v5914_v15  ;;  %v6013_v15 = vsub.f32 %v331_v61, %v926_v6  ;;  %v6064_v61 = vsub.f32 %v352_v40, %v989_v45  ;;  %v355_v6 = vld [vmem:[%s5924_s12 + $0xe8] sm:$0xff]  ;;  %v357_v40 = vld [vmem:[%s5924_s12 + $0xf8] sm:$0xff] }
  0x2f   : > { %715 = vmatprep.mubr.f32.mxu0 %v6585_v5  ;;  %v6032_v25 = vsub.f32 %v333_v21, %v932_v23 }
  0x31   : > { %v5539_v31 = vpack.c.bf16 %v6032_v25, %v6030_v24 }
  0x32   : > { %719 = vmatmul.mubr.f32.vlgmr.msra.gmra.mrb[0].mxu0 %v455_v16 }
  0x33   : > { %724 = vmatprep.mubr.f32.mxu0 %v6585_v5  ;;  %741 = vmatpush1.msra.mxu0 %v483_v18  ;;  %v5535_v18 = vpack.c.bf16 %v6013_v15, %v6011_v14 }
  0x34   : > { %820 = vmatprep.subr.mxu0 %v5907_v12  ;;  %v980_v12 = vand.u32 4294901760, %v5989_v63 }
  0x36   : > { %728 = vmatmul.mubr.f32.gmra.mrb[2].mxu0 %v466_v19  ;;  %v6062_v60 = vpack.c.bf16 %v980_v12, %v977_v11  ;;  %v995_v11 = vand.u32 4294901760, %v354_v4 }
  0x37   : > { %804 = vmatprep.mubr.f32.mxu0 %v6585_v5 }
  0x38   : > { %5474 = vmatprep.subr.bf16.mxu1 %v6062_v60 }
  0x3a   : > { %806 = vmatmul.mubr.f32.vlgmr.msra.gmra.mrb[0].mxu0 %v5901_v9 }
  0x3b   : > { %811 = vmatprep.mubr.f32.mxu0 %v6585_v5  ;;  %822 = vmatpush1.msra.mxu0 %v5899_v8  ;;  %v6003_v8 = vsub.f32 %v347_v53, %v974_v59  ;;  %v5543_v53 = vpack.c.bf16 %v6050_v39, %v6048_v38  ;;  %v944_v59 = vand.u32 4294901760, %v337_v52 }
  0x3c   : > { %5526 = vmatprep.subr.bf16.mxu0 %v5525_v51  ;;  %v336_v51 = vld [vmem:[%s5924_s12 + $0x50] sm:$0xff] }
  0x3d   : > { %v5533_v16 = vpack.c.bf16 %v6003_v8, %v6001_v7  ;;  %v941_v58 = vand.u32 4294901760, %v336_v51 }
  0x3e   : > { %813 = vmatmul.mubr.f32.gmra.mrb[2].mxu0 %v5903_v10 }
  0x3f   : > { %885 = vmatprep.mubr.f32.mxu0 %v6585_v5 }
  0x42   : > { %887 = vmatmul.mubr.f32.vlgmr.msra.gmra.mrb[0].mxu0 %v5901_v9  ;;  %v6021_v9 = vsub.f32 %v5989_v63, %v980_v12  ;;  %v6068_v63 = vpack.c.bf16 %v932_v23, %v929_v22  ;;  %v998_v12 = vand.u32 4294901760, %v355_v6  ;;  %v6086_v23 = vsub.f32 %v354_v4, %v995_v11 }
  0x43   : > { %892 = vmatprep.mubr.f32.mxu0 %v6585_v5  ;;  %5528 = vmatpush3.bf16.msra.mxu0 %v5527_v0  ;;  %v6070_v0 = vsub.f32 %v336_v51, %v941_v58  ;;  %v341_v51 = vld [vmem:[%s5924_s12 + $0x78] sm:$0xff] }
  0x44   : > { %5530 = vmatprep.subr.bf16.mxu0 %v5529_v2  ;;  %v5537_v19 = vpack.c.bf16 %v6021_v9, %v6018_v17  ;;  %v6072_v2 = vsub.f32 %v337_v52, %v944_v59  ;;  %5476 = vmatpush3.bf16.msra.mxu1 %v6068_v63  ;;  %v956_v52 = vand.u32 4294901760, %v341_v51 }
  0x46   : > { %894 = vmatmul.mubr.f32.gmra.mrb[2].mxu0 %v5903_v10  ;;  %v350_v10 = vld [vmem:[%s5924_s12 + $0xc0] sm:$0xff] }
  0x47   : > { %5532 = vmatpush3.bf16.msra.mxu0 %v5531_v13  ;;  %v983_v27 = vand.u32 4294901760, %v350_v10  ;;  %v5545_v13 = vpack.c.bf16 %v6066_v62, %v6064_v61 }
  0x48   : > { %5534 = vmatprep.subr.bf16.mxu0 %v5533_v16  ;;  %v338_v16 = vld [vmem:[%s5924_s12 + $0x60] sm:$0xff] }
  0x49   : > { %v6042_v35 = vsub.f32 %v350_v10, %v983_v27  ;;  %v947_v20 = vand.u32 4294901760, %v338_v16  ;;  %v6084_v22 = vpack.c.bf16 %v986_v28, %v983_v27  ;;  %v6088_v10 = vsub.f32 %v355_v6, %v998_v12 }
  0x4a   : > { %v1004_v28 = vand.u32 4294901760, %v357_v40 }
  0x4b   : > { %5536 = vmatpush3.bf16.msra.mxu0 %v5535_v18  ;;  %v5541_v43 = vpack.c.bf16 %v6044_v36, %v6042_v35  ;;  %v339_v18 = vld [vmem:[%s5924_s12 + $0x68] sm:$0xff]  ;;  %v6092_v29 = vsub.f32 %v338_v16, %v947_v20  ;;  %5478 = vmatprep.subr.bf16.mxu1 %v6084_v22  ;;  %v5549_v42 = vpack.c.bf16 %v6088_v10, %v6086_v23 }
  0x4c   : > { %5538 = vmatprep.subr.bf16.mxu0 %v5537_v19  ;;  %v5547_v19 = vpack.c.bf16 %v6072_v2, %v6070_v0  ;;  %v950_v21 = vand.u32 4294901760, %v339_v18  ;;  %5480 = vmatpush3.bf16.msra.mxu1 %v6090_v26  ;;  %v6110_v6 = vsub.f32 %v357_v40, %v1004_v28 }
  0x4e   : > { %v6094_v30 = vsub.f32 %v339_v18, %v950_v21  ;;  %v6116_v18 = vsub.f32 %v341_v51, %v956_v52 }
  0x4f   : > { %5540 = vmatpush3.bf16.msra.mxu0 %v5539_v31  ;;  %v356_v31 = vld [vmem:[%s5924_s12 + $0xf0] sm:$0xff] }
  0x50   : > { %5542 = vmatprep.subr.bf16.mxu0 %v5541_v43  ;;  %v1001_v27 = vand.u32 4294901760, %v356_v31  ;;  %v340_v43 = vld [vmem:[%s5924_s12 + $0x70] sm:$0xff]  ;;  %v5551_v32 = vpack.c.bf16 %v6094_v30, %v6092_v29 }
  0x51   : > { %v953_v33 = vand.u32 4294901760, %v340_v43 }
  0x52   : > { %v6108_v4 = vsub.f32 %v356_v31, %v1001_v27  ;;  %v6126_v31 = vpack.c.bf16 %v950_v21, %v947_v20 }
  0x53   : > { %5544 = vmatpush3.bf16.msra.mxu0 %v5543_v53  ;;  %v6106_v53 = vpack.c.bf16 %v992_v46, %v989_v45  ;;  %v6114_v16 = vsub.f32 %v340_v43, %v953_v33  ;;  %v6124_v46 = vpack.c.bf16 %v998_v12, %v995_v11  ;;  %v6135_v11 = vpack.c.bf16 %v956_v52, %v953_v33 }
  0x54   : > { %5546 = vmatprep.subr.bf16.mxu0 %v5545_v13  ;;  %v6112_v13 = vpack.c.bf16 %v944_v59, %v941_v58  ;;  %6613 = vst [vmem:[#allocation6_spill] sm:$0xff] %v6126_v31  ;;  %v1152_v58 = vand.u32 4294901760, %v5963_v49  ;;  %v1159_v59 = vand.u32 4294901760, %v5965_v50  ;;  %v1103_v33 = vand.u32 4294901760, %v6050_v39 }
  0x55   : > { %6610 = vst [vmem:[#allocation3_spill] sm:$0xff] %v6106_v53  ;;  %5482 = vmatprep.subr.bf16.mxu1 %v6106_v53  ;;  %v5555_v45 = vpack.c.bf16 %v6116_v18, %v6114_v16  ;;  %6612 = vst [vmem:[#allocation5_spill] sm:$0xff] %v6124_v46  ;;  %v1250_v53 = vand.u32 4294901760, %v6108_v4 }
  0x56   : > { %6611 = vst [vmem:[#allocation4_spill] sm:$0xff] %v6112_v13  ;;  %5484 = vmatpush3.bf16.msra.mxu1 %v6112_v13  ;;  %v5589_v40 = vpack.c.bf16 %v1159_v59, %v1152_v58  ;;  %v1153_v43 = vsub.f32 %v5963_v49, %v1152_v58  ;;  %6615 = vst [vmem:[#allocation8_spill] sm:$0xff] %v6135_v11  ;;  %v1160_v12 = vsub.f32 %v5965_v50, %v1159_v59 }
  0x57   : > { %5548 = vmatpush3.bf16.msra.mxu0 %v5547_v19  ;;  %v5553_v19 = vpack.c.bf16 %v6110_v6, %v6108_v4  ;;  %5486 = vmatprep.subr.bf16.mxu1 %v6124_v46  ;;  %v1208_v49 = vand.u32 4294901760, %v6042_v35  ;;  %v1096_v50 = vand.u32 4294901760, %v6048_v38  ;;  %v1236_v46 = vand.u32 4294901760, %v6086_v23 }
  0x58   : > { %5550 = vmatprep.subr.bf16.mxu0 %v5549_v42  ;;  %v6132_v42 = vpack.c.bf16 %v1004_v28, %v1001_v27  ;;  %v1154_v20 = vand.u32 4294901760, %v1153_v43  ;;  %v1161_v21 = vand.u32 4294901760, %v1160_v12  ;;  %v1215_v28 = vand.u32 4294901760, %v6044_v36 }
  0x59   : > { %v6151_v58 = vpack.c.bf16 %v1103_v33, %v1096_v50  ;;  %v1222_v43 = vand.u32 4294901760, %v6064_v61  ;;  %v1229_v12 = vand.u32 4294901760, %v6066_v62  ;;  %v1209_v5 = vsub.f32 %v6042_v35, %v1208_v49 }
  0x5a   : > { %5488 = vmatpush3.bf16.msra.mxu1 %v6126_v31  ;;  %6614 = vst [vmem:[#allocation7_spill] sm:$0xff] %v6132_v42  ;;  %v5493_v51 = vpack.c.bf16 %v1161_v21, %v1154_v20  ;;  %v6148_v52 = vpack.c.bf16 %v1215_v28, %v1208_v49  ;;  %v1110_v21 = vand.u32 4294901760, %v6070_v0  ;;  %v1243_v13 = vand.u32 4294901760, %v6088_v10 }
  0x5b   : > { %5552 = vmatpush3.bf16.msra.mxu0 %v5551_v32  ;;  %5490 = vmatprep.subr.bf16.mxu1 %v6132_v42  ;;  %v1082_v32 = vand.u32 4294901760, %v6030_v24  ;;  %v1124_v49 = vand.u32 4294901760, %v6092_v29 }
  0x5c   : > { %5554 = vmatprep.subr.bf16.mxu0 %v5553_v19  ;;  %v1089_v19 = vand.u32 4294901760, %v6032_v25 }
  0x5e   : > { %5492 = vmatpush3.bf16.msra.mxu1 %v6135_v11  ;;  %v6142_v27 = vpack.c.bf16 %v1089_v19, %v1082_v32  ;;  %v1090_v59 = vsub.f32 %v6032_v25, %v1089_v19  ;;  %v6159_v11 = vpack.c.bf16 %v1229_v12, %v1222_v43  ;;  %v1210_v19 = vand.u32 4294901760, %v1209_v5 }
  0x5f   : > { %5556 = vmatpush3.bf16.msra.mxu0 %v5555_v45  ;;  %5494 = vmatprep.subr.bf16.mxu1 %v5493_v51  ;;  %v1083_v45 = vsub.f32 %v6030_v24, %v1082_v32  ;;  %v1117_v51 = vand.u32 4294901760, %v6072_v2  ;;  %v1216_v24 = vsub.f32 %v6044_v36, %v1215_v28  ;;  %v1097_v32 = vsub.f32 %v6048_v38, %v1096_v50 }
  0x60   : > { %5590 = vmatprep.subr.bf16.mxu0 %v5589_v40  ;;  %v1091_v20 = vand.u32 4294901760, %v1090_v59  ;;  %v1131_v36 = vand.u32 4294901760, %v6094_v30  ;;  %v1223_v38 = vsub.f32 %v6064_v61, %v1222_v43  ;;  %v6175_v50 = vpack.c.bf16 %v1243_v13, %v1236_v46 }
  0x61   : > { %v1084_v40 = vand.u32 4294901760, %v1083_v45  ;;  %v6165_v25 = vpack.c.bf16 %v1117_v51, %v1110_v21  ;;  %v1104_v45 = vsub.f32 %v6050_v39, %v1103_v33  ;;  %v1217_v59 = vand.u32 4294901760, %v1216_v24 }
  0x62   : > { %v1098_v31 = vand.u32 4294901760, %v1097_v32  ;;  %v1230_v5 = vsub.f32 %v6066_v62, %v1229_v12  ;;  %v1111_v39 = vsub.f32 %v6070_v0, %v1110_v21  ;;  %v1118_v24 = vsub.f32 %v6072_v2, %v1117_v51 }
  0x63   : > { %v6163_v42 = vpack.c.bf16 %v1091_v20, %v1084_v40  ;;  %v1105_v35 = vand.u32 4294901760, %v1104_v45  ;;  %v6173_v28 = vpack.c.bf16 %v1217_v59, %v1210_v19  ;;  %v6181_v40 = vpack.c.bf16 %v1131_v36, %v1124_v49 }
  0x64   : > { %v1224_v20 = vand.u32 4294901760, %v1223_v38  ;;  %v1231_v32 = vand.u32 4294901760, %v1230_v5  ;;  %v1112_v45 = vand.u32 4294901760, %v1111_v39  ;;  %v1257_v61 = vand.u32 4294901760, %v6110_v6 }
  0x65   : > { %v6179_v33 = vpack.c.bf16 %v1105_v35, %v1098_v31  ;;  %v1119_v43 = vand.u32 4294901760, %v1118_v24  ;;  %v1138_v19 = vand.u32 4294901760, %v6114_v16  ;;  %v1145_v62 = vand.u32 4294901760, %v6116_v18 }
  0x66   : > { %v1237_v0 = vsub.f32 %v6086_v23, %v1236_v46  ;;  %v6189_v31 = vpack.c.bf16 %v1231_v32, %v1224_v20  ;;  %v6191_v12 = vpack.c.bf16 %v1257_v61, %v1250_v53  ;;  %v1244_v21 = vsub.f32 %v6088_v10, %v1243_v13 }
  0x67   : > { %v1125_v2 = vsub.f32 %v6092_v29, %v1124_v49  ;;  %v6195_v51 = vpack.c.bf16 %v1119_v43, %v1112_v45  ;;  %v6197_v59 = vpack.c.bf16 %v1145_v62, %v1138_v19  ;;  %v1132_v38 = vsub.f32 %v6094_v30, %v1131_v36 }
  0x68   : > { %v1238_v35 = vand.u32 4294901760, %v1237_v0  ;;  %v1245_v5 = vand.u32 4294901760, %v1244_v21  ;;  %v1251_v24 = vsub.f32 %v6108_v4, %v1250_v53  ;;  %v1258_v23 = vsub.f32 %v6110_v6, %v1257_v61 }
  0x69   : > { %v1126_v39 = vand.u32 4294901760, %v1125_v2  ;;  %v1133_v46 = vand.u32 4294901760, %v1132_v38  ;;  %v1139_v20 = vsub.f32 %v6114_v16, %v1138_v19  ;;  %v1146_v10 = vsub.f32 %v6116_v18, %v1145_v62  ;;  %v325_v16 = vld [vmem:[%s6579_s2] sm:$0x3] }
  0x6a   : > { %v6204_v13 = vpack.c.bf16 %v1245_v5, %v1238_v35  ;;  %v1252_v29 = vand.u32 4294901760, %v1251_v24  ;;  %v1259_v49 = vand.u32 4294901760, %v1258_v23  ;;  %v6601_v53 = vlaneseq }
  0x6b   : > { %v6206_v32 = vpack.c.bf16 %v1133_v46, %v1126_v39  ;;  %v1140_v45 = vand.u32 4294901760, %v1139_v20  ;;  %v1147_v43 = vand.u32 4294901760, %v1146_v10  ;;  %v1040_v24 = vand.u32 4294901760, %v5973_v54 }
  0x6c   : > { %v6208_v30 = vpack.c.bf16 %v1259_v49, %v1252_v29  ;;  %v6213_v4 = vshrl.u32 %v6601_v53, 7  ;;  %v1047_v23 = vand.u32 4294901760, %v5975_v55  ;;  %v1166_v10 = vand.u32 4294901760, %v5979_v56 }
  0x6d   : > { %v6210_v36 = vpack.c.bf16 %v1147_v43, %v1140_v45  ;;  %v1041_v46 = vsub.f32 %v5973_v54, %v1040_v24  ;;  %v1173_v29 = vand.u32 4294901760, %v5981_v57  ;;  %v1054_v49 = vand.u32 4294901760, %v5994_v1 }
  0x6e   : > { %6616 = vst [vmem:[#allocation9_spill] sm:$0xff] %v6213_v4  ;;  %v6600_v6 = vsub.s32 0, %v6213_v4  ;;  %v6599_v18 = vsub.s32 1, %v6213_v4  ;;  %v1048_v20 = vsub.f32 %v5975_v55, %v1047_v23  ;;  %v1061_v45 = vand.u32 4294901760, %v5999_v3 }
  0x6f   : > { %v5593_v54 = vpack.c.bf16 %v1173_v29, %v1166_v10  ;;  %v1174_v55 = vsub.f32 %v5981_v57, %v1173_v29 }
  0x70   : > { %v365_v61 = vrot.slane %v325_v16, %v6600_v6  ;;  %v369_v19 = vrot.slane %v325_v16, %v6599_v18  ;;  %v1042_v16 = vand.u32 4294901760, %v1041_v46  ;;  %v1068_v46 = vand.u32 4294901760, %v6011_v14 }
  0x71   : > { %v1062_v29 = vsub.f32 %v5999_v3, %v1061_v45  ;;  %v1175_v53 = vand.u32 4294901760, %v1174_v55  ;;  %v1201_v55 = vand.u32 4294901760, %v6021_v9 }
 0x115   : > { %v888_v62 = vpop.f32.mrb[0].mxu0 }
 0x116   : > { %v5677_v0 = vadd.f32 %v888_v62, %v365_v61  ;;  %v890_v21 = vpop.f32.mrb[1].mxu0 }
 0x117   : > { %v5678_v2 = vadd.f32 %v890_v21, %v369_v19  ;;  %v5591_v21 = vpack.c.bf16 %v1047_v23, %v1040_v24 }
 0x118   : > { %5796 = vtanh.f32 %v5677_v0 }
 0x119   : > { %5798 = vtanh.f32 %v5678_v2  ;;  %v895_v35 = vpop.f32.mrb[2].mxu0 }
 0x11a   : > { %v5679_v38 = vadd.f32 %v895_v35, %v365_v61  ;;  %v897_v5 = vpop.f32.mrb[3].mxu0  ;;  %v1049_v61 = vand.u32 4294901760, %v1048_v20  ;;  %v5595_v35 = vpack.c.bf16 %v1061_v45, %v1054_v49  ;;  %v1055_v20 = vsub.f32 %v5994_v1, %v1054_v49 }
 0x11b   : > { %v5680_v39 = vadd.f32 %v897_v5, %v369_v19  ;;  %v1167_v19 = vsub.f32 %v5979_v56, %v1166_v10  ;;  %v1187_v5 = vand.u32 4294901760, %v6003_v8  ;;  %v1075_v56 = vand.u32 4294901760, %v6013_v15 }
 0x11c   : > { %5800 = vtanh.f32 %v5679_v38  ;;  %v1180_v38 = vand.u32 4294901760, %v6001_v7  ;;  %v5495_v57 = vpack.c.bf16 %v1049_v61, %v1042_v16  ;;  %v1056_v61 = vand.u32 4294901760, %v1055_v20 }
 0x11d   : > { %5802 = vtanh.f32 %v5680_v39  ;;  %v1168_v10 = vand.u32 4294901760, %v1167_v19  ;;  %v1188_v16 = vsub.f32 %v6003_v8, %v1187_v5  ;;  %v1069_v20 = vsub.f32 %v6011_v14, %v1068_v46 }
 0x11e   : > { %v1181_v4 = vsub.f32 %v6001_v7, %v1180_v38  ;;  %v5597_v49 = vpack.c.bf16 %v1187_v5, %v1180_v38  ;;  %v1194_v7 = vand.u32 4294901760, %v6018_v17  ;;  %v5599_v14 = vpack.c.bf16 %v1075_v56, %v1068_v46 }
 0x11f   : > { %v5497_v38 = vpack.c.bf16 %v1175_v53, %v1168_v10 }
 0x122   : > { %v5797_v43 = vpop.eup %5796 }
 0x123   : > { %v5799_v62 = vpop.eup %5798  ;;  %v6233_v0 = vand.u32 4294901760, %v5797_v43 }
 0x124   : > { %v6236_v2 = vand.u32 4294901760, %v5799_v62 }
 0x125   : > { %v6241_v39 = vsub.f32 %v5797_v43, %v6233_v0 }
 0x126   : > { %v5801_v24 = vpop.eup %5800  ;;  %v6247_v23 = vsub.f32 %v5799_v62, %v6236_v2  ;;  %v1063_v62 = vand.u32 4294901760, %v1062_v29 }
 0x127   : > { %6617 = vst [vmem:[#allocation10_spill] sm:$0xff] %v6241_v39  ;;  %v5803_v18 = vpop.eup %5802  ;;  %v6250_v6 = vand.u32 4294901760, %v5801_v24  ;;  %v6606_v43 = vand.u32 4294901760, %v6241_v39 }
 0x128   : > { %1406 = vmatprep.mubr.f32.mxu0 %v6247_v23  ;;  %v6255_v26 = vand.u32 4294901760, %v5803_v18  ;;  %v1008_v1 = vand.u32 4294901760, %v6247_v23 }
 0x129   : > { %1409 = vmatmul.mubr.f32.vlgmr.msra.gmra.mrb[4].mxu0 %v6241_v39  ;;  %v6261_v3 = vsub.f32 %v5801_v24, %v6250_v6  ;;  %v1015_v45 = vsub.f32 %v6241_v39, %v6606_v43  ;;  %v1182_v24 = vand.u32 4294901760, %v1181_v4  ;;  %v1189_v43 = vand.u32 4294901760, %v1188_v16 }
 0x12a   : > { %5592 = vmatpush3.bf16.msra.mxu0 %v5591_v21  ;;  %v6268_v19 = vsub.f32 %v5803_v18, %v6255_v26  ;;  %v1009_v8 = vsub.f32 %v6247_v23, %v1008_v1  ;;  %v1076_v39 = vsub.f32 %v6013_v15, %v1075_v56  ;;  %v1202_v4 = vsub.f32 %v6021_v9, %v1201_v55 }
 0x12b   : > { %5594 = vmatprep.subr.bf16.mxu0 %v5593_v54  ;;  %v6608_v5 = vand.u32 4294901760, %v6261_v3  ;;  %v1016_v29 = vand.u32 4294901760, %v1015_v45  ;;  %v1195_v54 = vsub.f32 %v6018_v17, %v1194_v7  ;;  %v5601_v15 = vpack.c.bf16 %v1201_v55, %v1194_v7 }
 0x12c   : > { %1415 = vmatprep.mubr.f32.mxu0 %v6268_v19  ;;  %v1010_v21 = vand.u32 4294901760, %v1009_v8  ;;  %v1023_v18 = vand.u32 4294901760, %v6268_v19  ;;  %v5499_v45 = vpack.c.bf16 %v1063_v62, %v1056_v61  ;;  %v1070_v8 = vand.u32 4294901760, %v1069_v20 }
 0x12d   : > { %1418 = vmatmul.mubr.f32.gmra.mrb[6].mxu0 %v6261_v3  ;;  %v1030_v53 = vsub.f32 %v6261_v3, %v6608_v5  ;;  %v1077_v5 = vand.u32 4294901760, %v1076_v39  ;;  %v5501_v9 = vpack.c.bf16 %v1189_v43, %v1182_v24 }
 0x12e   : > { %5596 = vmatpush3.bf16.msra.mxu0 %v5595_v35  ;;  %1011 = vmatprep.mubr.f32.mxu1 %v1010_v21  ;;  %v1024_v10 = vsub.f32 %v6268_v19, %v1023_v18  ;;  %v1196_v35 = vand.u32 4294901760, %v1195_v54  ;;  %v1203_v21 = vand.u32 4294901760, %v1202_v4 }
 0x12f   : > { %1703 = vmatprep.mubr.f32.mxu0 %v6236_v2  ;;  %1017 = vmatmul.mubr.f32.vlgmr.msra.gmra.mrb[0].mxu1 %v1016_v29  ;;  %v1031_v17 = vand.u32 4294901760, %v1030_v53  ;;  %v5503_v46 = vpack.c.bf16 %v1077_v5, %v1070_v8 }
 0x130   : > { %5496 = vmatpush3.bf16.msra.mxu1 %v5495_v57  ;;  %5598 = vmatprep.subr.bf16.mxu0 %v5597_v49  ;;  %v1025_v16 = vand.u32 4294901760, %v1024_v10  ;;  %v5505_v56 = vpack.c.bf16 %v1203_v21, %v1196_v35 }
 0x131   : > { %5498 = vmatprep.subr.bf16.mxu1 %v5497_v38 }
 0x132   : > { %5600 = vmatpush3.bf16.msra.mxu0 %v5599_v14  ;;  %1026 = vmatprep.mubr.f32.mxu1 %v1025_v16 }
 0x133   : > { %1032 = vmatmul.mubr.f32.gmra.mrb[2].mxu1 %v1031_v17  ;;  %5602 = vmatprep.subr.bf16.mxu0 %v5601_v15 }
 0x134   : > { %5500 = vmatpush3.bf16.msra.mxu1 %v5499_v45  ;;  %1262 = vmatprep.mubr.f32.mxu1 %v6236_v2 }
 0x135   : > { %5502 = vmatprep.subr.bf16.mxu1 %v5501_v9 }
 0x136   : > { %5604 = vmatpush3.bf16.msra.mxu0 %v6142_v27  ;;  %v6620_v27 = vld [vmem:[#allocation4_spill] sm:$0xff] }
 0x137   : > { %5606 = vmatprep.subr.bf16.mxu0 %v6148_v52  ;;  %v6621_v52 = vld [vmem:[#allocation5_spill] sm:$0xff] }
 0x138   : > { %5504 = vmatpush3.bf16.msra.mxu1 %v5503_v46  ;;  %v6629_v46 = vlaneseq }
 0x139   : > { %5506 = vmatprep.subr.bf16.mxu1 %v5505_v56 }
 0x13a   : > { %5608 = vmatpush3.bf16.msra.mxu0 %v6151_v58  ;;  %v6622_v58 = vld [vmem:[#allocation6_spill] sm:$0xff]  ;;  %v6366_v56 = vand.u32 127, %v6629_v46 }
 0x13b   : > { %5610 = vmatprep.subr.bf16.mxu0 %v6159_v11  ;;  %v6619_v11 = vld [vmem:[#allocation3_spill] sm:$0xff] }
 0x13c   : > { %5508 = vmatpush3.bf16.msra.mxu1 %v6163_v42  ;;  %v6618_v42 = vld [vmem:[#allocation2_spill] sm:$0xff] }
 0x13d   : > { %5510 = vmatprep.subr.bf16.mxu1 %v6173_v28  ;;  %v6624_v28 = vld [vmem:[#allocation8_spill] sm:$0xff] }
 0x13e   : > { %5612 = vmatpush3.bf16.msra.mxu0 %v6165_v25  ;;  %v6623_v25 = vld [vmem:[#allocation7_spill] sm:$0xff] }
 0x13f   : > { %5614 = vmatprep.subr.bf16.mxu0 %v6175_v50  ;;  %v6625_v50 = vld [vmem:[#allocation10_spill] sm:$0xff] }
 0x140   : > { %5512 = vmatpush3.bf16.msra.mxu1 %v6179_v33  ;;  %v6626_v33 = vand.u32 4294901760, %v6625_v50 }
 0x141   : > { %5514 = vmatprep.subr.bf16.mxu1 %v6189_v31 }
 0x142   : > { %5616 = vmatpush3.bf16.msra.mxu0 %v6181_v40  ;;  %v6627_v40 = vand.u32 4294901760, %v6261_v3 }
 0x143   : > { %5618 = vmatprep.subr.bf16.mxu0 %v6191_v12 }
 0x144   : > { %5516 = vmatpush3.bf16.msra.mxu1 %v6195_v51 }
 0x145   : > { %5518 = vmatprep.subr.bf16.mxu1 %v6204_v13 }
 0x146   : > { %5620 = vmatpush3.bf16.msra.mxu0 %v6197_v59 }
 0x148   : > { %5520 = vmatpush3.bf16.msra.mxu1 %v6206_v32 }
 0x149   : > { %1705 = vmatmul.mubr.f32.vlgmr.msra.gmra.mrb[8].mxu0 %v6233_v0  ;;  %5522 = vmatprep.subr.bf16.mxu1 %v6208_v30 }
 0x14a   : > { %1710 = vmatprep.mubr.f32.mxu0 %v6255_v26 }
 0x14c   : > { %5524 = vmatpush3.bf16.msra.mxu1 %v6210_v36  ;;  %v4949_v36 = vld [vmem:[%s310_s17] ss:$0 sm:$0xff] }
 0x14d   : > { %1712 = vmatmul.mubr.f32.gmra.mrb[10].mxu0 %v6250_v6  ;;  %5558 = vmatprep.subr.bf16.mxu1 %v5938_v41 }
 0x14f   : > { %1264 = vmatmul.mubr.f32.vlgmr.msra.gmra.mrb[4].mxu1 %v6233_v0 }
 0x150   : > { %1269 = vmatprep.mubr.f32.mxu1 %v6255_v26  ;;  %5560 = vmatpush3.bf16.msra.mxu1 %v5940_v44 }
 0x151   : > { %5562 = vmatprep.subr.bf16.mxu1 %v5943_v47 }
 0x153   : > { %1271 = vmatmul.mubr.f32.gmra.mrb[6].mxu1 %v6250_v6 }
 0x154   : > { %5564 = vmatpush3.bf16.msra.mxu1 %v5948_v48  ;;  %1522 = vmatprep.mubr.f32.mxu1 %v1008_v1 }
 0x155   : > { %5566 = vmatprep.subr.bf16.mxu1 %v6040_v34 }
 0x158   : > { %5568 = vmatpush3.bf16.msra.mxu1 %v6046_v37 }
 0x159   : > { %5570 = vmatprep.subr.bf16.mxu1 %v6062_v60 }
 0x15c   : > { %5572 = vmatpush3.bf16.msra.mxu1 %v6068_v63 }
 0x15d   : > { %5574 = vmatprep.subr.bf16.mxu1 %v6084_v22 }
 0x160   : > { %5576 = vmatpush3.bf16.msra.mxu1 %v6618_v42 }
 0x161   : > { %5578 = vmatprep.subr.bf16.mxu1 %v6619_v11 }
 0x164   : > { %5580 = vmatpush3.bf16.msra.mxu1 %v6620_v27 }
 0x165   : > { %5582 = vmatprep.subr.bf16.mxu1 %v6621_v52 }
 0x168   : > { %5584 = vmatpush3.bf16.msra.mxu1 %v6622_v58 }
 0x169   : > { %5586 = vmatprep.subr.bf16.mxu1 %v6623_v25 }
 0x16c   : > { %5588 = vmatpush3.bf16.msra.mxu1 %v6624_v28 }
 0x16d   : > { %5622 = vmatprep.subr.bf16.mxu1 %v5938_v41  ;;  %v6628_v41 = vmov 0.0  }
 0x16f   : > { %1526 = vmatmul.mubr.f32.vlgmr.msra.gmra.mrb[8].mxu1 %v6626_v33 }
 0x170   : > { %1533 = vmatprep.mubr.f32.mxu1 %v1023_v18  ;;  %5624 = vmatpush3.bf16.msra.mxu1 %v5940_v44 }
 0x171   : > { %5626 = vmatprep.subr.bf16.mxu1 %v5943_v47 }
 0x173   : > { %1537 = vmatmul.mubr.f32.gmra.mrb[10].mxu1 %v6627_v40 }
 0x174   : > { %5628 = vmatpush3.bf16.msra.mxu1 %v5948_v48  ;;  %1814 = vmatprep.mubr.f32.mxu1 %v6236_v2 }
 0x175   : > { %5630 = vmatprep.subr.bf16.mxu1 %v6040_v34 }
 0x178   : > { %5632 = vmatpush3.bf16.msra.mxu1 %v6046_v37 }
 0x179   : > { %5634 = vmatprep.subr.bf16.mxu1 %v6062_v60 }
 0x17c   : > { %5636 = vmatpush3.bf16.msra.mxu1 %v6068_v63 }
 0x17d   : > { %5638 = vmatprep.subr.bf16.mxu1 %v6084_v22 }
 0x180   : > { %5640 = vmatpush3.bf16.msra.mxu1 %v6618_v42  ;;  %v6630_v42 = vld [vmem:[#allocation9_spill] sm:$0xff] }
 0x181   : > { %5642 = vmatprep.subr.bf16.mxu1 %v6619_v11  ;;  %vm2348_vm3 = vcmp.eq.s32.totalorder %v6630_v42, %v6366_v56  ;;  %vm2380_vm5 = vcmp.eq.s32.totalorder %v6630_v42, 0  ;;  %vm2403_vm6 = vcmp.eq.s32.totalorder %v6630_v42, 1  ;;  %vm2426_vm7 = vcmp.eq.s32.totalorder %v6630_v42, 2 }
 0x182   : > { %v6374_v11 = vsel %vm2348_vm3, 1.0, %v6628_v41  ;;  %vm2449_vm8 = vcmp.eq.s32.totalorder %v6630_v42, 3  ;;  %vm2472_vm9 = vcmp.eq.s32.totalorder %v6630_v42, 4  ;;  %vm2495_vm10 = vcmp.eq.s32.totalorder %v6630_v42, 5 }
 0x183   : > { %vm2518_vm11 = vcmp.eq.s32.totalorder %v6630_v42, 6  ;;  %vm2541_vm12 = vcmp.eq.s32.totalorder %v6630_v42, 7 }
 0x184   : > { %5644 = vmatpush3.bf16.msra.mxu1 %v6620_v27  ;;  %v2351_v27 = vmul.f32 2e-06, %v6374_v11 }
 0x185   : > { %5646 = vmatprep.subr.bf16.mxu1 %v6621_v52  ;;  %v2357_v52 = vmul.f32 0.0001, %v6374_v11 }
 0x186   : > { %2353 = vrot.lane.b32.xlu1 %v2351_v27, %s5829_s18  ;;  %v5834_v27 = vmov 3  }
 0x188   : > { %5648 = vmatpush3.bf16.msra.mxu1 %v6622_v58 }
 0x189   : > { %5650 = vmatprep.subr.bf16.mxu1 %v6623_v25 }
 0x18a   : > { %2359 = vrot.lane.b32.xlu1 %v2357_v52, %s5829_s18 }
 0x18c   : > { %5652 = vmatpush3.bf16.msra.mxu1 %v6624_v28 }
 0x18d   : > { %5311 = vmatprep.subr.mxu1 %v6628_v41 }
 0x18e   : > { %2368 = vrot.lane.b32.xlu1 %v6374_v11, %s5829_s18 }
 0x18f   : > { %1816 = vmatmul.mubr.f32.vlgmr.msra.gmra.mrb[12].mxu1 %v6233_v0 }
 0x190   : > { %1821 = vmatprep.mubr.f32.mxu1 %v6255_v26 }
 0x193   : > { %1823 = vmatmul.mubr.f32.gmra.mrb[14].mxu1 %v6250_v6 }
 0x194   : > { %5313 = vmatprep.mubr.msk.f32.mxu1 %vm5839_vm13, %v6628_v41 }
 0x1fc   : > { %v5065_v44 = vpop.f32.mrb[4].mxu0 }
 0x1fd   : > { %v5066_v47 = vpop.f32.mrb[5].mxu0 }
 0x1fe   : > { %v5067_v48 = vadd.f32 %v5066_v47, %v5065_v44 }
 0x200   : > { %v5068_v34 = vpop.f32.mrb[6].mxu0 }
 0x201   : > { %v5069_v37 = vpop.f32.mrb[7].mxu0 }
 0x202   : > { %v5070_v60 = vadd.f32 %v5069_v37, %v5068_v34  ;;  %v4989_v63 = vpop.f32.mrb[0].mxu1 }
 0x203   : > { %v4990_v22 = vpop.f32.mrb[1].mxu1 }
 0x204   : > { %v4991_v31 = vadd.f32 %v4990_v22, %v4989_v63 }
 0x206   : > { %v4992_v12 = vpop.f32.mrb[2].mxu1  ;;  %v1019_v23 = vadd.f32 %v4991_v31, %v4949_v36 }
 0x207   : > { %v4993_v51 = vpop.f32.mrb[3].mxu1 }
 0x208   : > { %v4994_v59 = vadd.f32 %v4993_v51, %v4992_v12 }
 0x20a   : > { %v1034_v3 = vadd.f32 %v4994_v59, %v4949_v36 }
 0x21c   : > { %v5141_v13 = vpop.f32.mrb[8].mxu0 }
 0x21d   : > { %v5142_v32 = vpop.f32.mrb[9].mxu0 }
 0x21e   : > { %v5143_v26 = vadd.f32 %v5142_v32, %v5141_v13 }
 0x220   : > { %v5144_v30 = vpop.f32.mrb[10].mxu0 }
 0x221   : > { %v5145_v6 = vpop.f32.mrb[11].mxu0 }
 0x222   : > { %v5146_v0 = vadd.f32 %v5145_v6, %v5144_v30  ;;  %v5027_v2 = vpop.f32.mrb[4].mxu1 }
 0x223   : > { %v5028_v39 = vpop.f32.mrb[5].mxu1 }
 0x224   : > { %v5029_v57 = vadd.f32 %v5028_v39, %v5027_v2  ;;  %v2354_v2 = vpop.permute.xlu1 %2353 }
 0x226   : > { %v1266_v43 = vadd.f32 %v5029_v57, %v1019_v23  ;;  %v5030_v1 = vpop.f32.mrb[6].mxu1 }
 0x227   : > { %v5031_v49 = vpop.f32.mrb[7].mxu1 }
 0x228   : > { %v5032_v61 = vadd.f32 %v5031_v49, %v5030_v1  ;;  %v1411_v7 = vadd.f32 %v5067_v48, %v1266_v43  ;;  %v2360_v23 = vpop.permute.xlu1 %2359 }
 0x22a   : > { %v1273_v19 = vadd.f32 %v5032_v61, %v1034_v3 }
 0x22c   : > { %v1420_v62 = vadd.f32 %v5070_v60, %v1273_v19  ;;  %v2369_v3 = vpop.permute.xlu1 %2368 }
 0x242   : > { %v5103_v55 = vpop.f32.mrb[8].mxu1 }
 0x243   : > { %v5104_v38 = vpop.f32.mrb[9].mxu1 }
 0x244   : > { %v5105_v5 = vadd.f32 %v5104_v38, %v5103_v55 }
 0x246   : > { %v1528_v24 = vadd.f32 %v5105_v5, %v1411_v7  ;;  %v5106_v20 = vpop.f32.mrb[10].mxu1 }
 0x247   : > { %v5107_v18 = vpop.f32.mrb[11].mxu1 }
 0x248   : > { %v5108_v29 = vadd.f32 %v5107_v18, %v5106_v20  ;;  %v1707_v53 = vadd.f32 %v5143_v26, %v1528_v24  ;;  %v6631_v24 = vsub.s32 0, %v6630_v42 }
 0x24a   : > { %v1539_v54 = vadd.f32 %v5108_v29, %v1420_v62  ;;  %v5832_v62 = vmov 1  }
 0x24c   : > { %v1714_v4 = vadd.f32 %v5146_v0, %v1539_v54  ;;  %v5830_v0 = vmov 0  }
 0x24d   : > { %5783 = vset.pattern.permute.xlu1 %v5830_v0 }
 0x262   : > { %v5179_v14 = vpop.f32.mrb[12].mxu1 }
 0x263   : > { %v5180_v10 = vpop.f32.mrb[13].mxu1 }
 0x264   : > { %v5181_v15 = vadd.f32 %v5180_v10, %v5179_v14  ;;  %v5833_v14 = vmov 2  }
 0x265   : > { %5786 = vset.pattern.permute.xlu0 %v5833_v14 }
 0x266   : > { %v5182_v16 = vpop.f32.mrb[14].mxu1  ;;  %v1818_v45 = vadd.f32 %v5181_v15, %v1707_v53 }
 0x267   : > { %v5183_v8 = vpop.f32.mrb[15].mxu1 }
 0x268   : > { %v5184_v17 = vadd.f32 %v5183_v8, %v5182_v16  ;;  %v1829_v9 = vsel %vm1828_vm2, %v1818_v45, 0.0 }
 0x269   : > { %1830 = vadd.xlane.f32.xlu0 %v1829_v9 }
 0x26a   : > { %v1825_v35 = vadd.f32 %v5184_v17, %v1714_v4 }
 0x26c   : > { %v1832_v21 = vsel %vm1828_vm2, %v1825_v35, 0.0 }
 0x26d   : > { %1833 = vadd.xlane.f32.xlu0 %v1832_v21 }
 0x2f6   : > { %v1831_v58 = vpop.xlane.xlu0 %1830 }
 0x2f7   : > { %v1836_v25 = vmul.f32 0.0625, %v1831_v58  ;;  %v2435_v58 = vsub.s32 2, %v6630_v42 }
 0x2f9   : > { %v1838_v28 = vsub.f32 %v1818_v45, %v1836_v25  ;;  %v6632_v45 = vsub.s32 1, %v6630_v42 }
 0x2fa   : > { %v1834_v50 = vpop.xlane.xlu0 %1833 }
 0x2fb   : > { %v6379_v33 = vmul.f32 0.2581989, %v1838_v28  ;;  %v1837_v40 = vmul.f32 0.0625, %v1834_v50 }
 0x2fd   : > { %v1843_v44 = vsel %vm1828_vm2, %v6379_v33, 0  ;;  %v1839_v47 = vsub.f32 %v1825_v35, %v1837_v40 }
 0x2fe   : > { %v1849_v48 = vand.u32 4294901760, %v1843_v44 }
 0x2ff   : > { %v1841_v34 = vmul.f32 0.2581989, %v1839_v47 }
 0x300   : > { %v1916_v37 = vsub.f32 %v1843_v44, %v1849_v48 }
 0x301   : > { %v1846_v60 = vsel %vm1828_vm2, %v1841_v34, 0 }
 0x302   : > { %v1852_v63 = vand.u32 4294901760, %v1846_v60  ;;  %v1917_v22 = vand.u32 4294901760, %v1916_v37 }
 0x304   : > { %v1925_v31 = vsub.f32 %v1846_v60, %v1852_v63  ;;  %v5653_v12 = vpack.c.bf16 %v1852_v63, %v1849_v48  ;;  %v1918_v51 = vsub.f32 %v1916_v37, %v1917_v22 }
 0x306   : > { %v1926_v59 = vand.u32 4294901760, %v1925_v31  ;;  %5654 = vmatprep.subr.bf16.mxu0 %v5653_v12  ;;  %v1919_v13 = vand.u32 4294901760, %v1918_v51  ;;  %v5661_v36 = vpack.c.bf16 %v1925_v31, %v1916_v37 }
 0x307   : > { %5656 = vmatpush3.bf16.xpose.msra.mxu0 %v5653_v12 }
 0x308   : > { %5273 = vmatprep.mubr.f32.mxu0 %v1919_v13  ;;  %v1927_v32 = vsub.f32 %v1925_v31, %v1926_v59  ;;  %v5669_v6 = vpack.c.bf16 %v1926_v59, %v1917_v22 }
 0x30a   : > { %v1928_v26 = vand.u32 4294901760, %v1927_v32 }
 0x30c   : > { %v5657_v30 = vpack.c.bf16 %v1928_v26, %v1919_v13 }
 0x30e   : > { %5274 = vmatmul.mubr.f32.vlgmr.msra.gmra.mrb[12].mxu0 %v1928_v26  ;;  %5658 = vmatprep.subr.bf16.mxu0 %v5657_v30 }
 0x30f   : > { %5660 = vmatpush3.bf16.xpose.msra.mxu0 %v5657_v30  ;;  %5280 = vmatprep.mubr.f32.mxu0 %v1849_v48  ;;  %v5836_v30 = vmov 5  }
 0x310   : > { %5662 = vmatprep.subr.bf16.mxu0 %v5661_v36 }
 0x316   : > { %5281 = vmatmul.mubr.f32.vlgmr.msra.gmra.mrb[12].mxu0 %v1852_v63 }
 0x317   : > { %5664 = vmatpush3.bf16.xpose.msra.mxu0 %v5661_v36  ;;  %5287 = vmatprep.mubr.f32.mxu0 %v1916_v37  ;;  %v5835_v37 = vmov 4  }
 0x318   : > { %5666 = vmatprep.subr.bf16.mxu0 %v5653_v12 }
 0x31e   : > { %5288 = vmatmul.mubr.f32.vlgmr.msra.gmra.mrb[12].mxu0 %v1925_v31 }
 0x31f   : > { %5668 = vmatpush3.bf16.xpose.msra.mxu0 %v5653_v12  ;;  %5294 = vmatprep.mubr.f32.mxu0 %v1917_v22 }
 0x320   : > { %5670 = vmatprep.subr.bf16.mxu0 %v5669_v6 }
 0x326   : > { %5295 = vmatmul.mubr.f32.vlgmr.msra.gmra.mrb[12].mxu0 %v1926_v59 }
 0x327   : > { %5672 = vmatpush3.bf16.xpose.msra.mxu0 %v5669_v6  ;;  %5301 = vmatprep.mubr.f32.mxu0 %v1849_v48  ;;  %v2481_v6 = vsub.s32 4, %v6630_v42 }
 0x328   : > { %5674 = vmatprep.subr.bf16.mxu0 %v5653_v12 }
 0x32e   : > { %5302 = vmatmul.mubr.f32.vlgmr.msra.gmra.mrb[12].mxu0 %v1852_v63 }
 0x32f   : > { %5676 = vmatpush3.bf16.xpose.msra.mxu0 %v5653_v12  ;;  %5308 = vmatprep.mubr.f32.mxu0 %v1849_v48 }
 0x330   : > { %5341 = vmatprep.subr.mxu0 %v6628_v41 }
 0x336   : > { %5309 = vmatmul.mubr.f32.vlgmr.msra.gmra.mrb[12].mxu0 %v1852_v63  ;;  %v2458_v63 = vsub.s32 3, %v6630_v42 }
 0x337   : > { %5343 = vmatprep.mubr.msk.f32.mxu0 %vm5839_vm13, %v6628_v41 }
 0x409   : > { %v6385_v39 = vpop.f32.mrb[12].mxu0 }
 0x40a   : > { %v6388_v57 = vand.u32 4294901760, %v6385_v39  ;;  %v2335_v43 = vpop.f32.mrb[13].mxu0  ;;  %v6391_v1 = vadd.f32 %v6385_v39, %v2354_v2 }
 0x40c   : > { %v2362_v49 = vadd.f32 %v2360_v23, %v6391_v1  ;;  %5312 = vmatpush3.msra.mxu1 %v6388_v57 }
 0x40d   : > { %5316 = vmatprep.subr.mxu1 %v6628_v41 }
 0x40e   : > { %2364 = vrot.lane.b32.xlu0 %v2362_v49, %s5831_s19 }
 0x480   : > { %v2365_v61 = vpop.permute.xlu0 %2364 }
 0x481   : > { %v2372_v7 = vsel %vm2371_vm4, %v2365_v61, %v2369_v3 }
 0x482   : > { %2375 = vperm.xlu1 %5783, %v2372_v7   ;;  %v2381_v19 = vsel %vm2380_vm5, 0.0, %v2372_v7 }
 0x486   : > { %2384 = vperm.xlu1 %5783, %v2381_v19   ;;  %v5837_v19 = vmov 6  }
 0x48a   : > { %5784 = vset.pattern.permute.xlu1 %v5832_v62 }
 0x501   : > { %v2376_v55 = vpop.permute.xlu1 %2375 }
 0x502   : > { %5804 = vrcp.f32 %v2376_v55  ;;  %v2504_v55 = vsub.s32 5, %v6630_v42 }
 0x505   : > { %v2385_v18 = vpop.permute.xlu1 %2384 }
 0x50c   : > { %v5805_v38 = vpop.eup %5804 }
 0x50d   : > { %v2379_v5 = vmul.f32 %v5805_v38, %v2372_v7 }
 0x50f   : > { %v2390_v20 = vrot.slane %v2379_v5, %v6631_v24 }
 0x511   : > { %v2391_v29 = vmul.f32 %v2390_v20, %v2385_v18 }
 0x513   : > { %v2392_v53 = vsub.f32 %v2372_v7, %v2391_v29 }
 0x515   : > { %v2395_v54 = vsel %vm2380_vm5, %v2390_v20, %v2392_v53 }
 0x516   : > { %2398 = vperm.xlu1 %5784, %v2395_v54   ;;  %v2404_v4 = vsel %vm2403_vm6, 0.0, %v2395_v54 }
 0x51a   : > { %2407 = vperm.xlu1 %5784, %v2404_v4   ;;  %v5838_v4 = vmov 7  }
 0x51e   : > { %5785 = vset.pattern.permute.xlu1 %v5833_v14 }
 0x595   : > { %v2399_v10 = vpop.permute.xlu1 %2398 }
 0x596   : > { %5806 = vrcp.f32 %v2399_v10  ;;  %v2527_v10 = vsub.s32 6, %v6630_v42 }
 0x599   : > { %v2408_v17 = vpop.permute.xlu1 %2407 }
 0x5a0   : > { %v5807_v15 = vpop.eup %5806 }
 0x5a1   : > { %v2402_v16 = vmul.f32 %v5807_v15, %v2395_v54 }
 0x5a3   : > { %v2413_v8 = vrot.slane %v2402_v16, %v6632_v45 }
 0x5a5   : > { %v2414_v9 = vmul.f32 %v2413_v8, %v2408_v17 }
 0x5a7   : > { %v2415_v35 = vsub.f32 %v2395_v54, %v2414_v9 }
 0x5a9   : > { %v2418_v21 = vsel %vm2403_vm6, %v2413_v8, %v2415_v35 }
 0x5aa   : > { %2421 = vperm.xlu1 %5785, %v2418_v21   ;;  %v2427_v46 = vsel %vm2426_vm7, 0.0, %v2418_v21 }
 0x5ab   : > { %2430 = vperm.xlu0 %5786, %v2427_v46   ;;  %v4368_v46 = vmul.f32 %v6379_v33, %v6379_v33 }
 0x5ae   : > { %5787 = vset.pattern.permute.xlu1 %v5834_v27  ;;  %v4369_v27 = vsel %vm1828_vm2, %v4368_v46, 0.0 }
 0x5af   : > { %5788 = vset.pattern.permute.xlu0 %v5835_v37 }
 0x629   : > { %v2422_v52 = vpop.permute.xlu1 %2421 }
 0x62a   : > { %5808 = vrcp.f32 %v2422_v52  ;;  %v2431_v40 = vpop.permute.xlu0 %2430 }
 0x634   : > { %v5809_v25 = vpop.eup %5808 }
 0x635   : > { %v2425_v28 = vmul.f32 %v5809_v25, %v2418_v21 }
 0x637   : > { %v2436_v50 = vrot.slane %v2425_v28, %v2435_v58  ;;  %v2550_v58 = vsub.s32 7, %v6630_v42 }
 0x639   : > { %v2437_v44 = vmul.f32 %v2436_v50, %v2431_v40 }
 0x63b   : > { %v2438_v47 = vsub.f32 %v2418_v21, %v2437_v44 }
 0x63d   : > { %v2441_v48 = vsel %vm2426_vm7, %v2436_v50, %v2438_v47 }
 0x63e   : > { %2444 = vperm.xlu1 %5787, %v2441_v48   ;;  %v2450_v34 = vsel %vm2449_vm8, 0.0, %v2441_v48 }
 0x642   : > { %2453 = vperm.xlu1 %5787, %v2450_v34  }
 0x646   : > { %5789 = vset.pattern.permute.xlu1 %v5835_v37  ;;  %v2640_v37 = vsub.f32 %v6385_v39, %v6388_v57  ;;  %v359_v39 = vld [vmem:[%s314_s23] sm:$0xff] }
 0x6bd   : > { %v2445_v60 = vpop.permute.xlu1 %2444 }
 0x6be   : > { %5810 = vrcp.f32 %v2445_v60 }
 0x6c1   : > { %v2454_v51 = vpop.permute.xlu1 %2453 }
 0x6c8   : > { %v5811_v22 = vpop.eup %5810 }
 0x6c9   : > { %v2448_v31 = vmul.f32 %v5811_v22, %v2441_v48 }
 0x6cb   : > { %v2459_v12 = vrot.slane %v2448_v31, %v2458_v63  ;;  %v2641_v31 = vand.u32 4294901760, %v2640_v37 }
 0x6cd   : > { %v2460_v59 = vmul.f32 %v2459_v12, %v2454_v51 }
 0x6cf   : > { %v2461_v13 = vsub.f32 %v2441_v48, %v2460_v59  ;;  %v2642_v59 = vsub.f32 %v2640_v37, %v2641_v31 }
 0x6d1   : > { %v2464_v32 = vsel %vm2449_vm8, %v2459_v12, %v2461_v13 }
 0x6d2   : > { %2467 = vperm.xlu0 %5788, %v2464_v32   ;;  %v2473_v26 = vsel %vm2472_vm9, 0.0, %v2464_v32 }
 0x6d3   : > { %2476 = vperm.xlu1 %5789, %v2473_v26   ;;  %v2643_v26 = vand.u32 4294901760, %v2642_v59 }
 0x6d6   : > { %5791 = vset.pattern.permute.xlu0 %v5836_v30 }
 0x6d7   : > { %5790 = vset.pattern.permute.xlu1 %v5836_v30 }
 0x751   : > { %v2468_v36 = vpop.permute.xlu0 %2467 }
 0x752   : > { %5812 = vrcp.f32 %v2468_v36  ;;  %v2477_v43 = vpop.permute.xlu1 %2476 }
 0x75c   : > { %v5813_v0 = vpop.eup %5812 }
 0x75d   : > { %v2471_v2 = vmul.f32 %v5813_v0, %v2464_v32 }
 0x75f   : > { %v2482_v23 = vrot.slane %v2471_v2, %v2481_v6 }
 0x761   : > { %v2483_v49 = vmul.f32 %v2482_v23, %v2477_v43 }
 0x763   : > { %v2484_v3 = vsub.f32 %v2464_v32, %v2483_v49 }
 0x765   : > { %v2487_v61 = vsel %vm2472_vm9, %v2482_v23, %v2484_v3 }
 0x766   : > { %2490 = vperm.xlu1 %5790, %v2487_v61   ;;  %v2496_v7 = vsel %vm2495_vm10, 0.0, %v2487_v61 }
 0x767   : > { %2499 = vperm.xlu0 %5791, %v2496_v7  }
 0x76a   : > { %5792 = vset.pattern.permute.xlu1 %v5837_v19  ;;  %v4488_v19 = vsub.f32 %v6374_v11, %v6374_v11  ;;  %v360_v11 = vld [vmem:[%s317_s28] sm:$0x1] }
 0x76b   : > { %5793 = vset.pattern.permute.xlu0 %v5838_v4 }
 0x7e5   : > { %v2491_v62 = vpop.permute.xlu1 %2490 }
 0x7e6   : > { %5814 = vrcp.f32 %v2491_v62  ;;  %v2500_v20 = vpop.permute.xlu0 %2499  ;;  %v5840_v62 = vmov 1.0  }
 0x7f0   : > { %v5815_v38 = vpop.eup %5814 }
 0x7f1   : > { %v2494_v5 = vmul.f32 %v5815_v38, %v2487_v61  ;;  %v4489_v38 = vand.u32 4294901760, %v4488_v19 }
 0x7f3   : > { %v2505_v24 = vrot.slane %v2494_v5, %v2504_v55  ;;  %v4490_v5 = vsub.f32 %v4488_v19, %v4489_v38 }
 0x7f5   : > { %v2506_v18 = vmul.f32 %v2505_v24, %v2500_v20  ;;  %v3009_v20 = vsel %vm2371_vm4, %v360_v11, 0 }
 0x7f7   : > { %v2507_v29 = vsub.f32 %v2487_v61, %v2506_v18  ;;  %v3077_v18 = vand.u32 4294901760, %v3009_v20 }
 0x7f9   : > { %v2510_v53 = vsel %vm2495_vm10, %v2505_v24, %v2507_v29  ;;  %v4491_v24 = vand.u32 4294901760, %v4490_v5  ;;  %v3078_v29 = vsub.f32 %v3009_v20, %v3077_v18 }
 0x7fa   : > { %2513 = vperm.xlu1 %5792, %v2510_v53   ;;  %v2519_v54 = vsel %vm2518_vm11, 0.0, %v2510_v53 }
 0x7fe   : > { %2522 = vperm.xlu1 %5792, %v2519_v54  }
 0x802   : > { %5794 = vset.pattern.permute.xlu1 %v5838_v4 }
 0x879   : > { %v2514_v14 = vpop.permute.xlu1 %2513 }
 0x87a   : > { %5816 = vrcp.f32 %v2514_v14 }
 0x87d   : > { %v2523_v8 = vpop.permute.xlu1 %2522 }
 0x884   : > { %v5817_v15 = vpop.eup %5816 }
 0x885   : > { %v2517_v16 = vmul.f32 %v5817_v15, %v2510_v53 }
 0x887   : > { %v2528_v45 = vrot.slane %v2517_v16, %v2527_v10 }
 0x889   : > { %v2529_v17 = vmul.f32 %v2528_v45, %v2523_v8 }
 0x88b   : > { %v2530_v9 = vsub.f32 %v2510_v53, %v2529_v17  ;;  %v3079_v53 = vand.u32 4294901760, %v3078_v29 }
 0x88d   : > { %v2533_v35 = vsel %vm2518_vm11, %v2528_v45, %v2530_v9  ;;  %v3080_v54 = vsub.f32 %v3078_v29, %v3079_v53 }
 0x88e   : > { %2536 = vperm.xlu0 %5793, %v2533_v35   ;;  %v2542_v21 = vsel %vm2541_vm12, 0.0, %v2533_v35 }
 0x88f   : > { %2545 = vperm.xlu1 %5794, %v2542_v21   ;;  %v3081_v14 = vand.u32 4294901760, %v3080_v54 }
 0x8ad   : > { %4370 = vadd.xlane.f32.xlu0 %v4369_v27 }
 0x90d   : > { %v2537_v52 = vpop.permute.xlu0 %2536 }
 0x90e   : > { %5818 = vrcp.f32 %v2537_v52  ;;  %v2546_v40 = vpop.permute.xlu1 %2545 }
 0x918   : > { %v5819_v25 = vpop.eup %5818 }
 0x919   : > { %v2540_v28 = vmul.f32 %v5819_v25, %v2533_v35 }
 0x91b   : > { %v2551_v50 = vrot.slane %v2540_v28, %v2550_v58 }
 0x91d   : > { %v2552_v44 = vmul.f32 %v2551_v50, %v2546_v40 }
 0x91f   : > { %v2553_v47 = vsub.f32 %v2533_v35, %v2552_v44 }
 0x921   : > { %v2556_v33 = vsel %vm2541_vm12, %v2551_v50, %v2553_v47 }
 0x922   : > { %2558 = vrot.lane.b32.xlu1 %v2556_v33, %s5831_s19 }
 0x926   : > { %3907 = vrot.lane.b32.xlu1 %v6391_v1, %s5831_s19  ;;  %v3458_v1 = vsel %vm2371_vm4, %v359_v39, 0 }
 0x927   : > { %v3461_v30 = vand.u32 4294901760, %v3458_v1 }
 0x929   : > { %v3527_v36 = vsub.f32 %v3458_v1, %v3461_v30 }
 0x92b   : > { %v3528_v6 = vand.u32 4294901760, %v3527_v36 }
 0x92d   : > { %v3529_v0 = vsub.f32 %v3527_v36, %v3528_v6 }
 0x92f   : > { %v3530_v2 = vand.u32 4294901760, %v3529_v0 }
 0x93a   : > { %v4371_v48 = vpop.xlane.xlu0 %4370 }
 0x93b   : > { %v4372_v34 = vadd.f32 2e-06, %v4371_v48 }
 0x94f   : > { %4375 = vxpose.xlu1.b32.start.end [1/1] (short) (narrow) %v4372_v34, 8 }
 0x994   : > { %v2559_v60 = vpop.permute.xlu1 %2558 }
 0x995   : > { %v2560_v63 = vsel %vm2371_vm4, %v2559_v60, 0 }
 0x996   : > { %v2628_v22 = vand.u32 4294901760, %v2560_v63 }
 0x998   : > { %v2629_v12 = vsub.f32 %v2560_v63, %v2628_v22 }
 0x99a   : > { %v2630_v51 = vand.u32 4294901760, %v2629_v12 }
 0x99c   : > { %v2631_v13 = vsub.f32 %v2629_v12, %v2630_v51 }
 0x99e   : > { %v2632_v32 = vand.u32 4294901760, %v2631_v13 }
 0x9a0   : > { %5314 = vmatmul.mubr.f32.vlgmr.msra.gmra.mrb[16].mxu1 %v2632_v32 }
 0x9a1   : > { %5317 = vmatpush3.msra.mxu1 %v2643_v26  ;;  %5318 = vmatprep.mubr.msk.f32.mxu1 %vm5839_vm13, %v6628_v41 }
 0x9a2   : > { %5321 = vmatprep.subr.mxu1 %v6628_v41 }
 0x9a8   : > { %5319 = vmatmul.mubr.f32.vlgmr.msra.gmra.mrb[16].mxu1 %v2628_v22 }
 0x9a9   : > { %5322 = vmatpush3.msra.mxu1 %v2640_v37  ;;  %5323 = vmatprep.mubr.msk.f32.mxu1 %vm5839_vm13, %v6628_v41 }
 0x9aa   : > { %5326 = vmatprep.subr.mxu1 %v6628_v41 }
 0x9b0   : > { %5324 = vmatmul.mubr.f32.vlgmr.msra.gmra.mrb[16].mxu1 %v2629_v12 }
 0x9b1   : > { %5327 = vmatpush3.msra.mxu1 %v6388_v57  ;;  %5328 = vmatprep.mubr.msk.f32.mxu1 %vm5839_vm13, %v6628_v41 }
 0x9b2   : > { %5331 = vmatprep.subr.mxu1 %v6628_v41 }
 0x9b8   : > { %5329 = vmatmul.mubr.f32.vlgmr.msra.gmra.mrb[16].mxu1 %v2630_v51 }
 0x9b9   : > { %5332 = vmatpush3.msra.mxu1 %v2641_v31  ;;  %5333 = vmatprep.mubr.msk.f32.mxu1 %vm5839_vm13, %v6628_v41 }
 0x9ba   : > { %5336 = vmatprep.subr.mxu1 %v6628_v41 }
 0x9c0   : > { %5334 = vmatmul.mubr.f32.vlgmr.msra.gmra.mrb[16].mxu1 %v2628_v22 }
 0x9c1   : > { %5337 = vmatpush3.msra.mxu1 %v6388_v57  ;;  %5338 = vmatprep.mubr.msk.f32.mxu1 %vm5839_vm13, %v6628_v41  ;;  %v6495_v57 = vpop.permute.xlu1 %3907 }
 0x9c2   : > { %5371 = vmatprep.subr.mxu1 %v6628_v41 }
 0x9c8   : > { %5339 = vmatmul.mubr.f32.vlgmr.msra.gmra.mrb[16].mxu1 %v2628_v22 }
 0x9c9   : > { %5372 = vmatpush3.xpose.msra.mxu1 %v3461_v30  ;;  %5373 = vmatprep.mubr.msk.f32.mxu1 %vm5839_vm13, %v6628_v41 }
 0x9ca   : > { %5376 = vmatprep.subr.mxu1 %v6628_v41 }
 0x9cc   : > { %5374 = vmatmul.mubr.f32.vlgmr.msra.gmra.mrb[18].mxu1 %v3530_v2 }
 0x9cd   : > { %5377 = vmatpush3.xpose.msra.mxu1 %v3530_v2  ;;  %5378 = vmatprep.mubr.msk.f32.mxu1 %vm5839_vm13, %v6628_v41 }
 0x9ce   : > { %5381 = vmatprep.subr.mxu1 %v6628_v41 }
 0x9cf   : > { %v4391_v23 = vpop.trf.xlu1 }
 0x9d0   : > { %v4408_v43 = vsel %vm2371_vm4, %v4391_v23, 0 }
 0x9d1   : > { %v4476_v49 = vand.u32 4294901760, %v4408_v43 }
 0x9d3   : > { %v4477_v3 = vsub.f32 %v4408_v43, %v4476_v49 }
 0x9d4   : > { %5379 = vmatmul.mubr.f32.vlgmr.msra.gmra.mrb[18].mxu1 %v3461_v30 }
 0x9d5   : > { %5382 = vmatpush3.xpose.msra.mxu1 %v3527_v36  ;;  %5383 = vmatprep.mubr.msk.f32.mxu1 %vm5839_vm13, %v6628_v41  ;;  %v4478_v61 = vand.u32 4294901760, %v4477_v3 }
 0x9d6   : > { %5386 = vmatprep.subr.mxu1 %v6628_v41 }
 0x9d7   : > { %v4479_v7 = vsub.f32 %v4477_v3, %v4478_v61 }
 0x9d9   : > { %v4480_v55 = vand.u32 4294901760, %v4479_v7 }
 0x9dc   : > { %5384 = vmatmul.mubr.f32.vlgmr.msra.gmra.mrb[18].mxu1 %v3527_v36 }
 0x9dd   : > { %5387 = vmatpush3.xpose.msra.mxu1 %v3461_v30  ;;  %5388 = vmatprep.mubr.msk.f32.mxu1 %vm5839_vm13, %v6628_v41 }
 0x9de   : > { %5391 = vmatprep.subr.mxu1 %v6628_v41 }
 0x9e4   : > { %5389 = vmatmul.mubr.f32.vlgmr.msra.gmra.mrb[18].mxu1 %v3528_v6 }
 0x9e5   : > { %5392 = vmatpush3.xpose.msra.mxu1 %v3528_v6  ;;  %5393 = vmatprep.mubr.msk.f32.mxu1 %vm5839_vm13, %v6628_v41 }
 0x9e6   : > { %5396 = vmatprep.subr.mxu1 %v6628_v41 }
 0x9ec   : > { %5394 = vmatmul.mubr.f32.vlgmr.msra.gmra.mrb[18].mxu1 %v3461_v30 }
 0x9ed   : > { %5397 = vmatpush3.xpose.msra.mxu1 %v3461_v30  ;;  %5398 = vmatprep.mubr.msk.f32.mxu1 %vm5839_vm13, %v6628_v41 }
 0x9ee   : > { %5431 = vmatprep.subr.mxu1 %v6628_v41 }
 0x9f4   : > { %5399 = vmatmul.mubr.f32.vlgmr.msra.gmra.mrb[18].mxu1 %v3461_v30 }
 0x9f5   : > { %5433 = vmatprep.mubr.msk.f32.mxu1 %vm5839_vm13, %v6628_v41  ;;  %5432 = vmatpush3.msk.msra.mxu1 %vm2348_vm3, %v5840_v62 }
 0x9f6   : > { %5436 = vmatprep.subr.mxu1 %v6628_v41 }
 0x9f8   : > { %5434 = vmatmul.mubr.f32.vlgmr.msra.gmra.mrb[20].mxu1 %v4480_v55 }
 0x9f9   : > { %5438 = vmatprep.mubr.msk.f32.mxu1 %vm5839_vm13, %v6628_v41  ;;  %5437 = vmatpush3.msra.mxu1 %v4491_v24 }
 0x9fa   : > { %5441 = vmatprep.subr.mxu1 %v6628_v41 }
 0xa00   : > { %5439 = vmatmul.mubr.f32.vlgmr.msra.gmra.mrb[20].mxu1 %v4476_v49 }
 0xa01   : > { %5442 = vmatpush3.msra.mxu1 %v4488_v19  ;;  %5443 = vmatprep.mubr.msk.f32.mxu1 %vm5839_vm13, %v6628_v41 }
 0xa02   : > { %5446 = vmatprep.subr.mxu1 %v6628_v41 }
 0xa08   : > { %5444 = vmatmul.mubr.f32.vlgmr.msra.gmra.mrb[20].mxu1 %v4477_v3 }
 0xa09   : > { %5447 = vmatpush3.msk.msra.mxu1 %vm2348_vm3, %v5840_v62  ;;  %5448 = vmatprep.mubr.msk.f32.mxu1 %vm5839_vm13, %v6628_v41 }
 0xa0a   : > { %5451 = vmatprep.subr.mxu1 %v6628_v41 }
 0xa10   : > { %5449 = vmatmul.mubr.f32.vlgmr.msra.gmra.mrb[20].mxu1 %v4478_v61 }
 0xa11   : > { %5452 = vmatpush3.msra.mxu1 %v4489_v38  ;;  %5453 = vmatprep.mubr.msk.f32.mxu1 %vm5839_vm13, %v6628_v41 }
 0xa12   : > { %5456 = vmatprep.subr.mxu1 %v6628_v41 }
 0xa18   : > { %5454 = vmatmul.mubr.f32.vlgmr.msra.gmra.mrb[20].mxu1 %v4476_v49 }
 0xa19   : > { %5457 = vmatpush3.msk.msra.mxu1 %vm2348_vm3, %v5840_v62  ;;  %5458 = vmatprep.mubr.msk.f32.mxu1 %vm5839_vm13, %v6628_v41 }
 0xa20   : > { %5459 = vmatmul.mubr.f32.vlgmr.msra.gmra.mrb[20].mxu1 %v4476_v49 }
 0xa9b   : > { %v6529_v4 = vpop.f32.mrb[16].mxu1 }
 0xa9c   : > { %v3012_v56 = vand.u32 4294901760, %v6529_v4  ;;  %v5340_v42 = vpop.f32.mrb[17].mxu1 }
 0xa9e   : > { %v3089_v10 = vsub.f32 %v6529_v4, %v3012_v56  ;;  %5342 = vmatpush3.msra.mxu0 %v3012_v56 }
 0xa9f   : > { %5344 = vmatmul.mubr.f32.vlgmr.msra.gmra.mrb[14].mxu0 %v3081_v14  ;;  %5346 = vmatprep.subr.mxu0 %v6628_v41 }
 0xaa0   : > { %v3090_v15 = vand.u32 4294901760, %v3089_v10  ;;  %5348 = vmatprep.mubr.msk.f32.mxu0 %vm5839_vm13, %v6628_v41 }
 0xaa2   : > { %v3091_v16 = vsub.f32 %v3089_v10, %v3090_v15 }
 0xaa4   : > { %v3092_v45 = vand.u32 4294901760, %v3091_v16 }
 0xaa6   : > { %5347 = vmatpush3.msra.mxu0 %v3092_v45 }
 0xaa7   : > { %5349 = vmatmul.mubr.f32.vlgmr.msra.gmra.mrb[14].mxu0 %v3077_v18  ;;  %5351 = vmatprep.subr.mxu0 %v6628_v41 }
 0xaa8   : > { %5352 = vmatpush3.msra.mxu0 %v3089_v10  ;;  %5353 = vmatprep.mubr.msk.f32.mxu0 %vm5839_vm13, %v6628_v41 }
 0xaa9   : > { %5356 = vmatprep.subr.mxu0 %v6628_v41 }
 0xaaf   : > { %5354 = vmatmul.mubr.f32.vlgmr.msra.gmra.mrb[14].mxu0 %v3078_v29 }
 0xab0   : > { %5357 = vmatpush3.msra.mxu0 %v3012_v56  ;;  %5358 = vmatprep.mubr.msk.f32.mxu0 %vm5839_vm13, %v6628_v41 }
 0xab1   : > { %5361 = vmatprep.subr.mxu0 %v6628_v41 }
 0xab7   : > { %5359 = vmatmul.mubr.f32.vlgmr.msra.gmra.mrb[14].mxu0 %v3079_v53 }
 0xab8   : > { %5362 = vmatpush3.msra.mxu0 %v3090_v15  ;;  %5363 = vmatprep.mubr.msk.f32.mxu0 %vm5839_vm13, %v6628_v41 }
 0xab9   : > { %5366 = vmatprep.subr.mxu0 %v6628_v41 }
 0xabf   : > { %5364 = vmatmul.mubr.f32.vlgmr.msra.gmra.mrb[14].mxu0 %v3077_v18 }
 0xac0   : > { %5367 = vmatpush3.msra.mxu0 %v3012_v56  ;;  %5368 = vmatprep.mubr.msk.f32.mxu0 %vm5839_vm13, %v6628_v41 }
 0xac1   : > { %5401 = vmatprep.subr.mxu0 %v6628_v41 }
 0xac7   : > { %5369 = vmatmul.mubr.f32.vlgmr.msra.gmra.mrb[14].mxu0 %v3077_v18  ;;  %v3902_v8 = vpop.f32.mrb[18].mxu1 }
 0xac8   : > { %v3910_v17 = vsub.f32 %v3902_v8, %v6495_v57  ;;  %5402 = vmatpush3.msra.mxu0 %v3012_v56  ;;  %v5400_v9 = vpop.f32.mrb[19].mxu1  ;;  %5403 = vmatprep.mubr.msk.f32.mxu0 %vm5839_vm13, %v6628_v41 }
 0xac9   : > { %5406 = vmatprep.subr.mxu0 %v6628_v41 }
 0xaca   : > { %v3912_v35 = vsel %vm2371_vm4, %v3910_v17, 0 }
 0xacb   : > { %v3980_v21 = vand.u32 4294901760, %v3912_v35 }
 0xacd   : > { %v3981_v46 = vsub.f32 %v3912_v35, %v3980_v21 }
 0xacf   : > { %v3982_v27 = vand.u32 4294901760, %v3981_v46 }
 0xad1   : > { %v3983_v52 = vsub.f32 %v3981_v46, %v3982_v27 }
 0xad3   : > { %v3984_v58 = vand.u32 4294901760, %v3983_v52 }
 0xad5   : > { %5404 = vmatmul.mubr.f32.vlgmr.msra.gmra.mrb[16].mxu0 %v3984_v58 }
 0xad6   : > { %5407 = vmatpush3.msra.mxu0 %v3092_v45  ;;  %5408 = vmatprep.mubr.msk.f32.mxu0 %vm5839_vm13, %v6628_v41 }
 0xad7   : > { %5411 = vmatprep.subr.mxu0 %v6628_v41 }
 0xadd   : > { %5409 = vmatmul.mubr.f32.vlgmr.msra.gmra.mrb[16].mxu0 %v3980_v21 }
 0xade   : > { %5412 = vmatpush3.msra.mxu0 %v3089_v10  ;;  %5413 = vmatprep.mubr.msk.f32.mxu0 %vm5839_vm13, %v6628_v41 }
 0xadf   : > { %5416 = vmatprep.subr.mxu0 %v6628_v41 }
 0xae5   : > { %5414 = vmatmul.mubr.f32.vlgmr.msra.gmra.mrb[16].mxu0 %v3981_v46 }
 0xae6   : > { %5417 = vmatpush3.msra.mxu0 %v3012_v56  ;;  %5418 = vmatprep.mubr.msk.f32.mxu0 %vm5839_vm13, %v6628_v41 }
 0xae7   : > { %5421 = vmatprep.subr.mxu0 %v6628_v41 }
 0xaed   : > { %5419 = vmatmul.mubr.f32.vlgmr.msra.gmra.mrb[16].mxu0 %v3982_v27 }
 0xaee   : > { %5422 = vmatpush3.msra.mxu0 %v3090_v15  ;;  %5423 = vmatprep.mubr.msk.f32.mxu0 %vm5839_vm13, %v6628_v41 }
 0xaef   : > { %5426 = vmatprep.subr.mxu0 %v6628_v41 }
 0xaf3   : > { %v4852_v25 = vpop.f32.mrb[20].mxu1 }
 0xaf4   : > { %v5460_v28 = vpop.f32.mrb[21].mxu1 }
 0xaf5   : > { %5424 = vmatmul.mubr.f32.vlgmr.msra.gmra.mrb[16].mxu0 %v3980_v21 }
 0xaf6   : > { %5427 = vmatpush3.msra.mxu0 %v3012_v56  ;;  %5428 = vmatprep.mubr.msk.f32.mxu0 %vm5839_vm13, %v6628_v41 }
 0xafd   : > { %5429 = vmatmul.mubr.f32.vlgmr.msra.gmra.mrb[16].mxu0 %v3980_v21 }
 0xb9a   : > { %v3453_v50 = vpop.f32.mrb[14].mxu0 }
 0xb9b   : > { %4374 = vst.msk [vmem:[%s321_s9] sm:$0x1] %vm4373_vm14, %v3453_v50  ;;  %v5370_v40 = vpop.f32.mrb[15].mxu0 }
 0xbd0   : > { %v4356_v44 = vpop.f32.mrb[16].mxu0 }
 0xbd1   : > { %v4360_v47 = vmul.f32 %v4356_v44, %v6529_v4  ;;  %v5430_v33 = vpop.f32.mrb[17].mxu0 }
 0xbd3   : > { %v4361_v48 = vsel %vm2371_vm4, %v4360_v47, 0.0 }
 0xbd4   : > { %v4362_v34 = vrot.slane %v4361_v48, 4 }
 0xbd6   : > { %v4363_v41 = vadd.f32 %v4362_v34, %v4361_v48 }
 0xbd8   : > { %v4364_v37 = vrot.slane %v4363_v41, 2 }
 0xbda   : > { %v4365_v60 = vadd.f32 %v4364_v37, %v4363_v41 }
 0xbdc   : > { %v4366_v63 = vrot.slane %v4365_v60, 1 }
 0xbde   : > { %v4367_v22 = vadd.f32 %v4366_v63, %v4365_v60 }
 0xbe0   : > { %v5681_v31 = vadd.f32 %v4852_v25, %v4367_v22 }
 0xbe2   : > { %4856 = vst.msk [vmem:[%s321_s9 + $0x1] sm:$0x1] %vm4373_vm14, %v5681_v31 }
 0xbe3 PF: > { %s17_s24 = sadd.s32 1, %s5826_s24  }
 0xbe4   : > { %p14_p4 = scmp.ge.s32.totalorder %s17_s24, 4  }
 0xbe6   :  { %16 = sbr.rel (!%p14_p4) target bundleno = 1 (0x1), region = 87 }

</bundles_post_ra>
